<compile_context>
chip_gen: v7x
topology: tpu7x:2x2x1
jax: 0.10.0
libtpu: 0.0.40
codegen_flags: <defaults>
</compile_context>

<pallas_src>
import functools

import jax
import jax.numpy as jnp
from jax.experimental import pallas as pl
from jax.experimental.pallas import tpu as pltpu


# ----------------------------- Pallas kernels -----------------------------


def _linear_kernel(x_ref, w_ref, b_ref, o_ref):
    o_ref[...] = (jnp.dot(x_ref[...], w_ref[...],
                          preferred_element_type=jnp.float32) + b_ref[...])


def linear(x, w, b):
    """Single-invocation (M, K) @ (K, N) + (1, N) on the MXU (whole arrays in VMEM)."""
    M = x.shape[0]
    N = w.shape[1]
    return pl.pallas_call(
        _linear_kernel,
        out_shape=jax.ShapeDtypeStruct((M, N), jnp.float32),
    )(x, w, b)


def _bigru_seq_kernel(gi_ref, whh_ref, bhh_ref, out_ref, h_scr):
    """One (direction, time) step of a GRU scan over the full sequence.

    gi_ref  : (3, B, H)  precomputed x_t @ Wih + bih for this (dir, t), per gate
    whh_ref : (3, H, H)  recurrent weights for this direction (VMEM-resident)
    bhh_ref : (3, 1, H)
    out_ref : (B, H)     hidden state written back for this (dir, original t)
    h_scr   : (B, H)     running hidden state, persists across the time axis
    """
    t = pl.program_id(1)

    @pl.when(t == 0)
    def _():
        h_scr[...] = jnp.zeros_like(h_scr)

    h = h_scr[...]
    gh = [jnp.dot(h, whh_ref[g], preferred_element_type=jnp.float32) + bhh_ref[g]
          for g in range(3)]
    r = jax.nn.sigmoid(gi_ref[0] + gh[0])
    z = jax.nn.sigmoid(gi_ref[1] + gh[1])
    n = jnp.tanh(gi_ref[2] + r * gh[2])
    h_new = (1.0 - z) * n + z * h
    h_scr[...] = h_new
    out_ref[...] = h_new


def bigru_seq(gi, whh, bhh):
    """gi: (2, T, 3, B, H) -> outputs (2, T, B, H) in natural time order."""
    _, T, _, B, H = gi.shape

    def t_idx(d, t):
        # d == 0: forward scan reads/writes time t ;  d == 1: backward scan reads/writes T-1-t
        return t + d * (T - 1 - 2 * t)

    return pl.pallas_call(
        _bigru_seq_kernel,
        out_shape=jax.ShapeDtypeStruct((2, T, B, H), jnp.float32),
        grid=(2, T),
        in_specs=[
            pl.BlockSpec((None, None, 3, B, H),
                         lambda d, t: (d, t_idx(d, t), 0, 0, 0)),
            pl.BlockSpec((None, 3, H, H), lambda d, t: (d, 0, 0, 0)),
            pl.BlockSpec((None, 3, 1, H), lambda d, t: (d, 0, 0, 0)),
        ],
        out_specs=pl.BlockSpec((None, None, B, H),
                               lambda d, t: (d, t_idx(d, t), 0, 0)),
        scratch_shapes=[pltpu.VMEM((B, H), jnp.float32)],
        compiler_params=pltpu.CompilerParams(
            dimension_semantics=("parallel", "arbitrary")),
    )(gi, whh, bhh)


def _decoder_seq_kernel(num_layers, emb_ref, epart_ref, enc_ref,
                        wh_ref, b_ref, v_ref, hinit_ref, *rest):
    """One teacher-forced decode step: attention + num_layers GRU cells.

    rest = per-layer weight refs (5 for layer 0, 4 for each later layer),
           then out_ref (B, H) and scratch h_scr (L, B, H).
    """
    layer_refs = rest[:-2]
    out_ref = rest[-2]
    h_scr = rest[-1]

    @pl.when(pl.program_id(0) == 0)
    def _():
        h_scr[...] = hinit_ref[...]

    # ------- attention: all batch rows at once; probabilities are internal only -------
    hsum = jnp.sum(h_scr[...], axis=0)                                   # (B, H)
    hpart = jnp.dot(hsum, wh_ref[...],
                    preferred_element_type=jnp.float32) + b_ref[...]     # (B, H)
    # energy = relu([hsum, enc] @ W_attn + b) split as hsum@Wh + enc@We (We part hoisted).
    energy = jnp.maximum(epart_ref[...] + hpart[:, None, :], 0.0)        # (B, S, H)
    scores = jnp.sum(energy * v_ref[...], axis=-1, keepdims=True)        # (B, S, 1)
    m = jnp.max(scores, axis=1, keepdims=True)
    e = jnp.exp(scores - m)
    a = e / jnp.sum(e, axis=1, keepdims=True)                            # (B, S, 1)
    weighted = jnp.sum(a * enc_ref[...], axis=1)                         # (B, H)

    emb_t = emb_ref[...]                                                 # (B, E)

    # ------- multi-layer GRU (per-gate weights: no lane-slicing of a 3H vector) -------
    x = None
    idx = 0
    for l in range(num_layers):
        if l == 0:
            # Layer-0 input is cat(embedded, weighted); Wih is split so no concat needed.
            wie, wiw, whh, bih, bhh = layer_refs[idx:idx + 5]
            idx += 5
            gi = [jnp.dot(emb_t, wie[g], preferred_element_type=jnp.float32)
                  + jnp.dot(weighted, wiw[g], preferred_element_type=jnp.float32)
                  + bih[g] for g in range(3)]
        else:
            wih, whh, bih, bhh = layer_refs[idx:idx + 4]
            idx += 4
            gi = [jnp.dot(x, wih[g], preferred_element_type=jnp.float32) + bih[g]
                  for g in range(3)]
        h_l = h_scr[l]
        gh = [jnp.dot(h_l, whh[g], preferred_element_type=jnp.float32) + bhh[g]
              for g in range(3)]
        r = jax.nn.sigmoid(gi[0] + gh[0])
        z = jax.nn.sigmoid(gi[1] + gh[1])
        n = jnp.tanh(gi[2] + r * gh[2])
        h_new = (1.0 - z) * n + z * h_l
        h_scr[l] = h_new
        x = h_new
    out_ref[...] = x                                                     # lane-dense (B, H)


def decoder_seq(emb_seq, epart, enc_perm, h_init, params, num_layers):
    """Run the whole teacher-forced decode loop in one fused Pallas call.

    Returns the top-layer hidden state at every step: (T, B, H)."""
    T, B, E = emb_seq.shape
    _, S, H = enc_perm.shape
    L = num_layers

    def const(shape):
        return pl.BlockSpec(shape, lambda t: (0,) * len(shape))

    layer_args = []
    for l in range(L):
        p = params["dec"][l]
        if l == 0:
            layer_args += [p["wih_e"], p["wih_w"], p["whh"], p["bih"], p["bhh"]]
        else:
            layer_args += [p["wih"], p["whh"], p["bih"], p["bhh"]]

    kernel = functools.partial(_decoder_seq_kernel, L)
    return pl.pallas_call(
        kernel,
        out_shape=jax.ShapeDtypeStruct((T, B, H), jnp.float32),
        grid=(T,),
        in_specs=[
            pl.BlockSpec((None, B, E), lambda t: (t, 0, 0)),   # embedded tokens, per step
            const((B, S, H)),                                  # enc @ We (hoisted, resident)
            const((B, S, H)),                                  # encoder outputs (resident)
            const((H, H)), const((1, H)), const((1, H)),       # attn Wh, b, v
            const((L, B, H)),                                  # initial decoder hidden
        ] + [const(a.shape) for a in layer_args],              # GRU weights (resident)
        out_specs=pl.BlockSpec((None, B, H), lambda t: (t, 0, 0)),
        scratch_shapes=[pltpu.VMEM((L, B, H), jnp.float32)],
        compiler_params=pltpu.CompilerParams(
            dimension_semantics=("arbitrary",)),
    )(emb_seq, epart, enc_perm,
      params["attn_wh"], params["attn_b"], params["attn_v"], h_init,
      *layer_args)


# --------------------------- model (plain-JAX glue) ---------------------------


def init_params(key, vocab_size, img_dim, hid, emb, num_layers):
    keys = [key]

    def nxt():
        keys[0], sub = jax.random.split(keys[0])
        return sub

    def W(shape, scale=0.1):
        return jax.random.normal(nxt(), shape, jnp.float32) * scale

    params = {}
    # Encoder: bidirectional multi-layer GRU; weights stored per (direction, gate).
    enc = []
    for l in range(num_layers):
        in_dim = img_dim if l == 0 else 2 * hid
        enc.append(dict(
            wih=W((in_dim, 2, 3, hid)),      # (in, dir, gate, H)
            bih=W((1, 2, 3, hid)),
            whh=W((2, 3, hid, hid)),         # (dir, gate, H, H)
            bhh=W((2, 3, 1, hid)),
        ))
    params["enc"] = enc
    # Attention: Linear(2H, H) split into [Wh ; We]; v: Linear(H, 1, bias=False) as a row.
    params["attn_wh"] = W((hid, hid))
    params["attn_we"] = W((hid, hid))
    params["attn_b"] = W((1, hid))
    params["attn_v"] = W((1, hid))
    # Decoder: embedding, multi-layer GRU (per-gate weights), fc_out.
    params["emb"] = W((vocab_size, emb))
    dec = []
    for l in range(num_layers):
        if l == 0:
            dec.append(dict(wih_e=W((3, emb, hid)), wih_w=W((3, hid, hid)),
                            whh=W((3, hid, hid)),
                            bih=W((3, 1, hid)), bhh=W((3, 1, hid))))
        else:
            dec.append(dict(wih=W((3, hid, hid)), whh=W((3, hid, hid)),
                            bih=W((3, 1, hid)), bhh=W((3, 1, hid))))
    params["dec"] = dec
    params["fc_w"] = W((hid, vocab_size))
    params["fc_b"] = W((1, vocab_size))
    return params


def encoder_forward(src, params, num_layers, hid):
    """Bidirectional multi-layer GRU encoder.

    Matches the PyTorch reference:
      outputs = out[:, :, :H] + out[:, :, H:]        (sum over directions)
      hidden  = h_n.view(L, 2, B, H).sum(dim=1)      (sum over directions)
    """
    # TODO(synk): nn.Dropout on src / between GRU layers treated as identity (eval mode).
    T, B, _ = src.shape
    x = src
    hiddens = []
    for l in range(num_layers):
        p = params["enc"][l]
        in_dim = x.shape[2]
        # Input->hidden projection for the whole sequence, both directions, all
        # gates: one big MXU matmul (no sequential dependence).
        wih2d = p["wih"].reshape(in_dim, 2 * 3 * hid)
        bih2d = p["bih"].reshape(1, 2 * 3 * hid)
        gi_flat = linear(x.reshape(T * B, in_dim), wih2d, bih2d)         # (T*B, 6H)
        gi = gi_flat.reshape(T, B, 2, 3, hid).transpose(2, 0, 3, 1, 4)    # (2, T, 3, B, H)
        ys = bigru_seq(gi, p["whh"], p["bhh"])                            # (2, T, B, H)
        yf, yb = ys[0], ys[1]
        x = jnp.concatenate([yf, yb], axis=2)        # (T, B, 2H) feeds the next layer
        hiddens.append(yf[-1] + yb[0])               # sum of per-direction final hiddens
    outputs = x[:, :, :hid] + x[:, :, hid:]          # (T, B, H)
    hidden = jnp.stack(hiddens, axis=0)              # (L, B, H)
    return outputs, hidden


def seq2seq_forward(src, trg, params, num_layers, hid):
    T_trg, B = trg.shape
    enc_out, hidden = encoder_forward(src, params, num_layers, hid)       # (S,B,H), (L,B,H)
    S = enc_out.shape[0]
    enc_perm = jnp.transpose(enc_out, (1, 0, 2))                          # (B, S, H)

    # Hoist the encoder part of the attention energy (constant across decode steps).
    epart = linear(enc_perm.reshape(B * S, hid), params["attn_we"],
                   jnp.zeros((1, hid), jnp.float32)).reshape(B, S, hid)

    # TODO(synk): decoder embedding dropout treated as identity (eval mode).
    emb_seq = params["emb"][trg]                                          # (T, B, E) gather

    top = decoder_seq(emb_seq, epart, enc_perm, hidden, params, num_layers)  # (T, B, H)

    # fc_out applied once to all collected top-layer states (teacher forcing).
    V = params["fc_w"].shape[1]
    logits = linear(top.reshape(T_trg * B, hid), params["fc_w"], params["fc_b"])
    return jnp.transpose(logits.reshape(T_trg, B, V), (1, 0, 2))          # (B, T, V)


# ----------------------------------- main -----------------------------------

if __name__ == "__main__":
    VOCAB, IMG_DIM, HID, EMB, LAYERS = 32, 8, 32, 16, 2
    SRC_LEN, TRG_LEN, BATCH = 8, 4, 2

    key = jax.random.PRNGKey(0)
    k_src, k_trg, k_par = jax.random.split(key, 3)
    src = jax.random.normal(k_src, (SRC_LEN, BATCH, IMG_DIM), jnp.float32)
    trg = jax.random.randint(k_trg, (TRG_LEN, BATCH), 0, VOCAB, jnp.int32)
    params = init_params(k_par, VOCAB, IMG_DIM, HID, EMB, LAYERS)

    fwd = jax.jit(lambda s, t, p: seq2seq_forward(s, t, p, LAYERS, HID))
    out = fwd(src, trg, params)
    jax.block_until_ready(out)
    assert out.shape == (BATCH, TRG_LEN, VOCAB), out.shape
    assert out.dtype == jnp.float32
    print("KERNEL_OK")
</pallas_src>

<mosaic_0001>
module attributes {stable_mosaic.version = 11 : i64} {
  func.func @_linear_kernel(%arg0: memref<16x64xf32, #tpu.memory_space<vmem>>, %arg1: memref<64x192xf32, #tpu.memory_space<vmem>>, %arg2: memref<1x192xf32, #tpu.memory_space<vmem>>, %arg3: memref<16x192xf32, #tpu.memory_space<vmem>>) attributes {dimension_semantics = [], scalar_prefetch = 0 : i64, scratch_operands = 0 : i64, tpu.core_type = #tpu.core_type<tc>} {
    %c0 = arith.constant 0 : index
    %c0_0 = arith.constant 0 : index
    %0 = vector.load %arg0[%c0, %c0_0] : memref<16x64xf32, #tpu.memory_space<vmem>>, vector<16x64xf32>
    %c0_1 = arith.constant 0 : index
    %c0_2 = arith.constant 0 : index
    %1 = vector.load %arg1[%c0_1, %c0_2] : memref<64x192xf32, #tpu.memory_space<vmem>>, vector<64x192xf32>
    %cst = arith.constant dense<0.000000e+00> : vector<16x192xf32>
    %2 = tpu.matmul %0, %1, %cst {dimension_numbers = #tpu.dot_dimension_numbers<[1], [0], [0], [1], [0, 0, 1, 1], [], []>} : vector<16x64xf32>, vector<64x192xf32>, vector<16x192xf32> -> vector<16x192xf32>
    %c0_3 = arith.constant 0 : index
    %c0_4 = arith.constant 0 : index
    %3 = vector.load %arg2[%c0_3, %c0_4] : memref<1x192xf32, #tpu.memory_space<vmem>>, vector<1x192xf32>
    %4 = vector.broadcast %3 : vector<1x192xf32> to vector<16x192xf32>
    %5 = arith.addf %2, %4 : vector<16x192xf32>
    %c0_5 = arith.constant 0 : index
    %c0_6 = arith.constant 0 : index
    %6 = vector.load %arg3[%c0_5, %c0_6] : memref<16x192xf32, #tpu.memory_space<vmem>>, vector<16x192xf32>
    tpu.vector_store %arg3[%c0_5, %c0_6], %5 {strides = array<i32>} : memref<16x192xf32, #tpu.memory_space<vmem>>, vector<16x192xf32>,
    return
  }
}

module attributes {stable_mosaic.version = 11 : i64} {
  func.func @_linear_kernel(%arg0: memref<16x8xf32, #tpu.memory_space<vmem>>, %arg1: memref<8x192xf32, #tpu.memory_space<vmem>>, %arg2: memref<1x192xf32, #tpu.memory_space<vmem>>, %arg3: memref<16x192xf32, #tpu.memory_space<vmem>>) attributes {dimension_semantics = [], scalar_prefetch = 0 : i64, scratch_operands = 0 : i64, tpu.core_type = #tpu.core_type<tc>} {
    %c0 = arith.constant 0 : index
    %c0_0 = arith.constant 0 : index
    %0 = vector.load %arg0[%c0, %c0_0] : memref<16x8xf32, #tpu.memory_space<vmem>>, vector<16x8xf32>
    %c0_1 = arith.constant 0 : index
    %c0_2 = arith.constant 0 : index
    %1 = vector.load %arg1[%c0_1, %c0_2] : memref<8x192xf32, #tpu.memory_space<vmem>>, vector<8x192xf32>
    %cst = arith.constant dense<0.000000e+00> : vector<16x192xf32>
    %2 = tpu.matmul %0, %1, %cst {dimension_numbers = #tpu.dot_dimension_numbers<[1], [0], [0], [1], [0, 0, 1, 1], [], []>} : vector<16x8xf32>, vector<8x192xf32>, vector<16x192xf32> -> vector<16x192xf32>
    %c0_3 = arith.constant 0 : index
    %c0_4 = arith.constant 0 : index
    %3 = vector.load %arg2[%c0_3, %c0_4] : memref<1x192xf32, #tpu.memory_space<vmem>>, vector<1x192xf32>
    %4 = vector.broadcast %3 : vector<1x192xf32> to vector<16x192xf32>
    %5 = arith.addf %2, %4 : vector<16x192xf32>
    %c0_5 = arith.constant 0 : index
    %c0_6 = arith.constant 0 : index
    %6 = vector.load %arg3[%c0_5, %c0_6] : memref<16x192xf32, #tpu.memory_space<vmem>>, vector<16x192xf32>
    tpu.vector_store %arg3[%c0_5, %c0_6], %5 {strides = array<i32>} : memref<16x192xf32, #tpu.memory_space<vmem>>, vector<16x192xf32>,
    return
  }
}

module attributes {stable_mosaic.version = 11 : i64} {
  func.func @_bigru_seq_kernel(%arg0: i32, %arg1: i32, %arg2: memref<1x1x3x2x32xf32, #tpu.memory_space<vmem>>, %arg3: memref<1x3x32x32xf32, #tpu.memory_space<vmem>>, %arg4: memref<1x3x1x32xf32, #tpu.memory_space<vmem>>, %arg5: memref<1x1x2x32xf32, #tpu.memory_space<vmem>>, %arg6: memref<2x32xf32, #tpu.memory_space<vmem>>) attributes {dimension_semantics = [#tpu.dimension_semantics<parallel>, #tpu.dimension_semantics<arbitrary>], iteration_bounds = array<i64: 2, 8>, scalar_prefetch = 0 : i64, scratch_operands = 1 : i64, tpu.core_type = #tpu.core_type<tc>, window_params = [{transform_indices = @transform_0, window_bounds = array<i64: 1, 1, 3, 2, 32>}, {transform_indices = @transform_1, window_bounds = array<i64: 1, 3, 32, 32>}, {transform_indices = @transform_2, window_bounds = array<i64: 1, 3, 1, 32>}, {transform_indices = @transform_3, window_bounds = array<i64: 1, 1, 2, 32>}]} {
    %c0_i32 = arith.constant 0 : i32
    %0 = arith.cmpi eq, %arg1, %c0_i32 : i32
    %1 = arith.extui %0 : i1 to i32
    %c0_i32_0 = arith.constant 0 : i32
    %2 = arith.cmpi ne, %1, %c0_i32_0 : i32
    scf.if %2 {
      %cst_50 = arith.constant 0.000000e+00 : f32
      %55 = vector.broadcast %cst_50 : f32 to vector<2x32xf32>
      %c0_51 = arith.constant 0 : index
      %c0_52 = arith.constant 0 : index
      %56 = vector.load %arg6[%c0_51, %c0_52] : memref<2x32xf32, #tpu.memory_space<vmem>>, vector<2x32xf32>
      tpu.vector_store %arg6[%c0_51, %c0_52], %55 {strides = array<i32>} : memref<2x32xf32, #tpu.memory_space<vmem>>, vector<2x32xf32>,
    } else {
    }
    %c0 = arith.constant 0 : index
    %c0_1 = arith.constant 0 : index
    %3 = vector.load %arg6[%c0, %c0_1] : memref<2x32xf32, #tpu.memory_space<vmem>>, vector<2x32xf32>
    %c0_2 = arith.constant 0 : index
    %c0_3 = arith.constant 0 : index
    %c0_4 = arith.constant 0 : index
    %c0_5 = arith.constant 0 : index
    %4 = vector.load %arg3[%c0_2, %c0_3, %c0_4, %c0_5] : memref<1x3x32x32xf32, #tpu.memory_space<vmem>>, vector<1x1x32x32xf32>
    %5 = vector.shape_cast %4 : vector<1x1x32x32xf32> to vector<32x32xf32>
    %cst = arith.constant dense<0.000000e+00> : vector<2x32xf32>
    %6 = tpu.matmul %3, %5, %cst {dimension_numbers = #tpu.dot_dimension_numbers<[1], [0], [0], [1], [0, 0, 1, 1], [], []>} : vector<2x32xf32>, vector<32x32xf32>, vector<2x32xf32> -> vector<2x32xf32>
    %c0_6 = arith.constant 0 : index
    %c0_7 = arith.constant 0 : index
    %c0_8 = arith.constant 0 : index
    %c0_9 = arith.constant 0 : index
    %7 = vector.load %arg4[%c0_6, %c0_7, %c0_8, %c0_9] : memref<1x3x1x32xf32, #tpu.memory_space<vmem>>, vector<1x1x1x32xf32>
    %8 = vector.shape_cast %7 : vector<1x1x1x32xf32> to vector<1x32xf32>
    %9 = vector.broadcast %8 : vector<1x32xf32> to vector<2x32xf32>
    %10 = arith.addf %6, %9 : vector<2x32xf32>
    %c0_10 = arith.constant 0 : index
    %c1 = arith.constant 1 : index
    %c0_11 = arith.constant 0 : index
    %c0_12 = arith.constant 0 : index
    %11 = vector.load %arg3[%c0_10, %c1, %c0_11, %c0_12] : memref<1x3x32x32xf32, #tpu.memory_space<vmem>>, vector<1x1x32x32xf32>
    %12 = vector.shape_cast %11 : vector<1x1x32x32xf32> to vector<32x32xf32>
    %cst_13 = arith.constant dense<0.000000e+00> : vector<2x32xf32>
    %13 = tpu.matmul %3, %12, %cst_13 {dimension_numbers = #tpu.dot_dimension_numbers<[1], [0], [0], [1], [0, 0, 1, 1], [], []>} : vector<2x32xf32>, vector<32x32xf32>, vector<2x32xf32> -> vector<2x32xf32>
    %c0_14 = arith.constant 0 : index
    %c1_15 = arith.constant 1 : index
    %c0_16 = arith.constant 0 : index
    %c0_17 = arith.constant 0 : index
    %14 = vector.load %arg4[%c0_14, %c1_15, %c0_16, %c0_17] : memref<1x3x1x32xf32, #tpu.memory_space<vmem>>, vector<1x1x1x32xf32>
    %15 = vector.shape_cast %14 : vector<1x1x1x32xf32> to vector<1x32xf32>
    %16 = vector.broadcast %15 : vector<1x32xf32> to vector<2x32xf32>
    %17 = arith.addf %13, %16 : vector<2x32xf32>
    %c0_18 = arith.constant 0 : index
    %c2 = arith.constant 2 : index
    %c0_19 = arith.constant 0 : index
    %c0_20 = arith.constant 0 : index
    %18 = vector.load %arg3[%c0_18, %c2, %c0_19, %c0_20] : memref<1x3x32x32xf32, #tpu.memory_space<vmem>>, vector<1x1x32x32xf32>
    %19 = vector.shape_cast %18 : vector<1x1x32x32xf32> to vector<32x32xf32>
    %cst_21 = arith.constant dense<0.000000e+00> : vector<2x32xf32>
    %20 = tpu.matmul %3, %19, %cst_21 {dimension_numbers = #tpu.dot_dimension_numbers<[1], [0], [0], [1], [0, 0, 1, 1], [], []>} : vector<2x32xf32>, vector<32x32xf32>, vector<2x32xf32> -> vector<2x32xf32>
    %c0_22 = arith.constant 0 : index
    %c2_23 = arith.constant 2 : index
    %c0_24 = arith.constant 0 : index
    %c0_25 = arith.constant 0 : index
    %21 = vector.load %arg4[%c0_22, %c2_23, %c0_24, %c0_25] : memref<1x3x1x32xf32, #tpu.memory_space<vmem>>, vector<1x1x1x32xf32>
    %22 = vector.shape_cast %21 : vector<1x1x1x32xf32> to vector<1x32xf32>
    %23 = vector.broadcast %22 : vector<1x32xf32> to vector<2x32xf32>
    %24 = arith.addf %20, %23 : vector<2x32xf32>
    %c0_26 = arith.constant 0 : index
    %c0_27 = arith.constant 0 : index
    %c0_28 = arith.constant 0 : index
    %c0_29 = arith.constant 0 : index
    %c0_30 = arith.constant 0 : index
    %25 = vector.load %arg2[%c0_26, %c0_27, %c0_28, %c0_29, %c0_30] : memref<1x1x3x2x32xf32, #tpu.memory_space<vmem>>, vector<1x1x1x2x32xf32>
    %26 = vector.shape_cast %25 : vector<1x1x1x2x32xf32> to vector<2x32xf32>
    %27 = arith.addf %26, %10 : vector<2x32xf32>
    %28 = arith.negf %27 : vector<2x32xf32>
    %29 = math.exp %28 : vector<2x32xf32>
    %cst_31 = arith.constant 1.000000e+00 : f32
    %30 = vector.broadcast %cst_31 : f32 to vector<2x32xf32>
    %31 = arith.addf %30, %29 : vector<2x32xf32>
    %32 = arith.divf %30, %31 : vector<2x32xf32>
    %c0_32 = arith.constant 0 : index
    %c0_33 = arith.constant 0 : index
    %c1_34 = arith.constant 1 : index
    %c0_35 = arith.constant 0 : index
    %c0_36 = arith.constant 0 : index
    %33 = vector.load %arg2[%c0_32, %c0_33, %c1_34, %c0_35, %c0_36] : memref<1x1x3x2x32xf32, #tpu.memory_space<vmem>>, vector<1x1x1x2x32xf32>
    %34 = vector.shape_cast %33 : vector<1x1x1x2x32xf32> to vector<2x32xf32>
    %35 = arith.addf %34, %17 : vector<2x32xf32>
    %36 = arith.negf %35 : vector<2x32xf32>
    %37 = math.exp %36 : vector<2x32xf32>
    %cst_37 = arith.constant 1.000000e+00 : f32
    %38 = vector.broadcast %cst_37 : f32 to vector<2x32xf32>
    %39 = arith.addf %38, %37 : vector<2x32xf32>
    %40 = arith.divf %38, %39 : vector<2x32xf32>
    %c0_38 = arith.constant 0 : index
    %c0_39 = arith.constant 0 : index
    %c2_40 = arith.constant 2 : index
    %c0_41 = arith.constant 0 : index
    %c0_42 = arith.constant 0 : index
    %41 = vector.load %arg2[%c0_38, %c0_39, %c2_40, %c0_41, %c0_42] : memref<1x1x3x2x32xf32, #tpu.memory_space<vmem>>, vector<1x1x1x2x32xf32>
    %42 = vector.shape_cast %41 : vector<1x1x1x2x32xf32> to vector<2x32xf32>
    %43 = arith.mulf %32, %24 : vector<2x32xf32>
    %44 = arith.addf %42, %43 : vector<2x32xf32>
    %45 = math.tanh %44 : vector<2x32xf32>
    %cst_43 = arith.constant 1.000000e+00 : f32
    %46 = vector.broadcast %cst_43 : f32 to vector<2x32xf32>
    %47 = arith.subf %46, %40 : vector<2x32xf32>
    %48 = arith.mulf %47, %45 : vector<2x32xf32>
    %49 = arith.mulf %40, %3 : vector<2x32xf32>
    %50 = arith.addf %48, %49 : vector<2x32xf32>
    %c0_44 = arith.constant 0 : index
    %c0_45 = arith.constant 0 : index
    %51 = vector.load %arg6[%c0_44, %c0_45] : memref<2x32xf32, #tpu.memory_space<vmem>>, vector<2x32xf32>
    tpu.vector_store %arg6[%c0_44, %c0_45], %50 {strides = array<i32>} : memref<2x32xf32, #tpu.memory_space<vmem>>, vector<2x32xf32>,
    %c0_46 = arith.constant 0 : index
    %c0_47 = arith.constant 0 : index
    %c0_48 = arith.constant 0 : index
    %c0_49 = arith.constant 0 : index
    %52 = vector.load %arg5[%c0_46, %c0_47, %c0_48, %c0_49] : memref<1x1x2x32xf32, #tpu.memory_space<vmem>>, vector<1x1x2x32xf32>
    %53 = vector.shape_cast %52 : vector<1x1x2x32xf32> to vector<2x32xf32>
    %54 = vector.shape_cast %50 : vector<2x32xf32> to vector<1x1x2x32xf32>
    tpu.vector_store %arg5[%c0_46, %c0_47, %c0_48, %c0_49], %54 {strides = array<i32>} : memref<1x1x2x32xf32, #tpu.memory_space<vmem>>, vector<1x1x2x32xf32>,
    return
  }
  func.func @transform_0(%arg0: i32, %arg1: i32) -> (i32, i32, i32, i32, i32) {
    %c2_i32 = arith.constant 2 : i32
    %0 = arith.muli %c2_i32, %arg1 : i32
    %c7_i32 = arith.constant 7 : i32
    %1 = arith.subi %c7_i32, %0 : i32
    %2 = arith.muli %arg0, %1 : i32
    %3 = arith.addi %arg1, %2 : i32
    %c0_i32 = arith.constant 0 : i32
    %c0_i32_0 = arith.constant 0 : i32
    %c0_i32_1 = arith.constant 0 : i32
    %c0_i32_2 = arith.constant 0 : i32
    return %arg0, %3, %c0_i32, %c0_i32_0, %c0_i32_1 : i32, i32, i32, i32, i32
  }
  func.func @transform_1(%arg0: i32, %arg1: i32) -> (i32, i32, i32, i32) {
    %c0_i32 = arith.constant 0 : i32
    %c0_i32_0 = arith.constant 0 : i32
    %c0_i32_1 = arith.constant 0 : i32
    %c0_i32_2 = arith.constant 0 : i32
    return %arg0, %c0_i32, %c0_i32_0, %c0_i32_1 : i32, i32, i32, i32
  }
  func.func @transform_2(%arg0: i32, %arg1: i32) -> (i32, i32, i32, i32) {
    %c0_i32 = arith.constant 0 : i32
    %c0_i32_0 = arith.constant 0 : i32
    %c0_i32_1 = arith.constant 0 : i32
    %c0_i32_2 = arith.constant 0 : i32
    return %arg0, %c0_i32, %c0_i32_0, %c0_i32_1 : i32, i32, i32, i32
  }
  func.func @transform_3(%arg0: i32, %arg1: i32) -> (i32, i32, i32, i32) {
    %c2_i32 = arith.constant 2 : i32
    %0 = arith.muli %c2_i32, %arg1 : i32
    %c7_i32 = arith.constant 7 : i32
    %1 = arith.subi %c7_i32, %0 : i32
    %2 = arith.muli %arg0, %1 : i32
    %3 = arith.addi %arg1, %2 : i32
    %c0_i32 = arith.constant 0 : i32
    %c0_i32_0 = arith.constant 0 : i32
    %c0_i32_1 = arith.constant 0 : i32
    return %arg0, %3, %c0_i32, %c0_i32_0 : i32, i32, i32, i32
  }
}

module attributes {stable_mosaic.version = 11 : i64} {
  func.func @_linear_kernel(%arg0: memref<16x32xf32, #tpu.memory_space<vmem>>, %arg1: memref<32x32xf32, #tpu.memory_space<vmem>>, %arg2: memref<1x32xf32, #tpu.memory_space<vmem>>, %arg3: memref<16x32xf32, #tpu.memory_space<vmem>>) attributes {dimension_semantics = [], scalar_prefetch = 0 : i64, scratch_operands = 0 : i64, tpu.core_type = #tpu.core_type<tc>} {
    %c0 = arith.constant 0 : index
    %c0_0 = arith.constant 0 : index
    %0 = vector.load %arg0[%c0, %c0_0] : memref<16x32xf32, #tpu.memory_space<vmem>>, vector<16x32xf32>
    %c0_1 = arith.constant 0 : index
    %c0_2 = arith.constant 0 : index
    %1 = vector.load %arg1[%c0_1, %c0_2] : memref<32x32xf32, #tpu.memory_space<vmem>>, vector<32x32xf32>
    %cst = arith.constant dense<0.000000e+00> : vector<16x32xf32>
    %2 = tpu.matmul %0, %1, %cst {dimension_numbers = #tpu.dot_dimension_numbers<[1], [0], [0], [1], [0, 0, 1, 1], [], []>} : vector<16x32xf32>, vector<32x32xf32>, vector<16x32xf32> -> vector<16x32xf32>
    %c0_3 = arith.constant 0 : index
    %c0_4 = arith.constant 0 : index
    %3 = vector.load %arg2[%c0_3, %c0_4] : memref<1x32xf32, #tpu.memory_space<vmem>>, vector<1x32xf32>
    %4 = vector.broadcast %3 : vector<1x32xf32> to vector<16x32xf32>
    %5 = arith.addf %2, %4 : vector<16x32xf32>
    %c0_5 = arith.constant 0 : index
    %c0_6 = arith.constant 0 : index
    %6 = vector.load %arg3[%c0_5, %c0_6] : memref<16x32xf32, #tpu.memory_space<vmem>>, vector<16x32xf32>
    tpu.vector_store %arg3[%c0_5, %c0_6], %5 {strides = array<i32>} : memref<16x32xf32, #tpu.memory_space<vmem>>, vector<16x32xf32>,
    return
  }
}

module attributes {stable_mosaic.version = 11 : i64} {
  func.func @_linear_kernel(%arg0: memref<8x32xf32, #tpu.memory_space<vmem>>, %arg1: memref<32x32xf32, #tpu.memory_space<vmem>>, %arg2: memref<1x32xf32, #tpu.memory_space<vmem>>, %arg3: memref<8x32xf32, #tpu.memory_space<vmem>>) attributes {dimension_semantics = [], scalar_prefetch = 0 : i64, scratch_operands = 0 : i64, tpu.core_type = #tpu.core_type<tc>} {
    %c0 = arith.constant 0 : index
    %c0_0 = arith.constant 0 : index
    %0 = vector.load %arg0[%c0, %c0_0] : memref<8x32xf32, #tpu.memory_space<vmem>>, vector<8x32xf32>
    %c0_1 = arith.constant 0 : index
    %c0_2 = arith.constant 0 : index
    %1 = vector.load %arg1[%c0_1, %c0_2] : memref<32x32xf32, #tpu.memory_space<vmem>>, vector<32x32xf32>
    %cst = arith.constant dense<0.000000e+00> : vector<8x32xf32>
    %2 = tpu.matmul %0, %1, %cst {dimension_numbers = #tpu.dot_dimension_numbers<[1], [0], [0], [1], [0, 0, 1, 1], [], []>} : vector<8x32xf32>, vector<32x32xf32>, vector<8x32xf32> -> vector<8x32xf32>
    %c0_3 = arith.constant 0 : index
    %c0_4 = arith.constant 0 : index
    %3 = vector.load %arg2[%c0_3, %c0_4] : memref<1x32xf32, #tpu.memory_space<vmem>>, vector<1x32xf32>
    %4 = vector.broadcast %3 : vector<1x32xf32> to vector<8x32xf32>
    %5 = arith.addf %2, %4 : vector<8x32xf32>
    %c0_5 = arith.constant 0 : index
    %c0_6 = arith.constant 0 : index
    %6 = vector.load %arg3[%c0_5, %c0_6] : memref<8x32xf32, #tpu.memory_space<vmem>>, vector<8x32xf32>
    tpu.vector_store %arg3[%c0_5, %c0_6], %5 {strides = array<i32>} : memref<8x32xf32, #tpu.memory_space<vmem>>, vector<8x32xf32>,
    return
  }
}

module attributes {stable_mosaic.version = 11 : i64} {
  func.func @_decoder_seq_kernel(%arg0: i32, %arg1: memref<1x2x16xf32, #tpu.memory_space<vmem>>, %arg2: memref<2x8x32xf32, #tpu.memory_space<vmem>>, %arg3: memref<2x8x32xf32, #tpu.memory_space<vmem>>, %arg4: memref<32x32xf32, #tpu.memory_space<vmem>>, %arg5: memref<1x32xf32, #tpu.memory_space<vmem>>, %arg6: memref<1x32xf32, #tpu.memory_space<vmem>>, %arg7: memref<2x2x32xf32, #tpu.memory_space<vmem>>, %arg8: memref<3x16x32xf32, #tpu.memory_space<vmem>>, %arg9: memref<3x32x32xf32, #tpu.memory_space<vmem>>, %arg10: memref<3x32x32xf32, #tpu.memory_space<vmem>>, %arg11: memref<3x1x32xf32, #tpu.memory_space<vmem>>, %arg12: memref<3x1x32xf32, #tpu.memory_space<vmem>>, %arg13: memref<3x32x32xf32, #tpu.memory_space<vmem>>, %arg14: memref<3x32x32xf32, #tpu.memory_space<vmem>>, %arg15: memref<3x1x32xf32, #tpu.memory_space<vmem>>, %arg16: memref<3x1x32xf32, #tpu.memory_space<vmem>>, %arg17: memref<1x2x32xf32, #tpu.memory_space<vmem>>, %arg18: memref<2x2x32xf32, #tpu.memory_space<vmem>>) attributes {dimension_semantics = [#tpu.dimension_semantics<arbitrary>], iteration_bounds = array<i64: 4>, scalar_prefetch = 0 : i64, scratch_operands = 1 : i64, tpu.core_type = #tpu.core_type<tc>, window_params = [{transform_indices = @transform_0, window_bounds = array<i64: 1, 2, 16>}, {pipeline_mode = #tpu.pipeline_mode<synchronous>, transform_indices = @transform_1, window_bounds = array<i64: 2, 8, 32>}, {pipeline_mode = #tpu.pipeline_mode<synchronous>, transform_indices = @transform_2, window_bounds = array<i64: 2, 8, 32>}, {pipeline_mode = #tpu.pipeline_mode<synchronous>, transform_indices = @transform_3, window_bounds = array<i64: 32, 32>}, {pipeline_mode = #tpu.pipeline_mode<synchronous>, transform_indices = @transform_4, window_bounds = array<i64: 1, 32>}, {pipeline_mode = #tpu.pipeline_mode<synchronous>, transform_indices = @transform_5, window_bounds = array<i64: 1, 32>}, {pipeline_mode = #tpu.pipeline_mode<synchronous>, transform_indices = @transform_6, window_bounds = array<i64: 2, 2, 32>}, {pipeline_mode = #tpu.pipeline_mode<synchronous>, transform_indices = @transform_7, window_bounds = array<i64: 3, 16, 32>}, {pipeline_mode = #tpu.pipeline_mode<synchronous>, transform_indices = @transform_8, window_bounds = array<i64: 3, 32, 32>}, {pipeline_mode = #tpu.pipeline_mode<synchronous>, transform_indices = @transform_9, window_bounds = array<i64: 3, 32, 32>}, {pipeline_mode = #tpu.pipeline_mode<synchronous>, transform_indices = @transform_10, window_bounds = array<i64: 3, 1, 32>}, {pipeline_mode = #tpu.pipeline_mode<synchronous>, transform_indices = @transform_11, window_bounds = array<i64: 3, 1, 32>}, {pipeline_mode = #tpu.pipeline_mode<synchronous>, transform_indices = @transform_12, window_bounds = array<i64: 3, 32, 32>}, {pipeline_mode = #tpu.pipeline_mode<synchronous>, transform_indices = @transform_13, window_bounds = array<i64: 3, 32, 32>}, {pipeline_mode = #tpu.pipeline_mode<synchronous>, transform_indices = @transform_14, window_bounds = array<i64: 3, 1, 32>}, {pipeline_mode = #tpu.pipeline_mode<synchronous>, transform_indices = @transform_15, window_bounds = array<i64: 3, 1, 32>}, {transform_indices = @transform_16, window_bounds = array<i64: 1, 2, 32>}]} {
    %c0_i32 = arith.constant 0 : i32
    %0 = arith.cmpi eq, %arg0, %c0_i32 : i32
    %1 = arith.extui %0 : i1 to i32
    %c0_i32_0 = arith.constant 0 : i32
    %2 = arith.cmpi ne, %1, %c0_i32_0 : i32
    scf.if %2 {
      %c0_139 = arith.constant 0 : index
      %c0_140 = arith.constant 0 : index
      %c0_141 = arith.constant 0 : index
      %186 = vector.load %arg7[%c0_139, %c0_140, %c0_141] : memref<2x2x32xf32, #tpu.memory_space<vmem>>, vector<2x2x32xf32>
      %c0_142 = arith.constant 0 : index
      %c0_143 = arith.constant 0 : index
      %c0_144 = arith.constant 0 : index
      %187 = vector.load %arg18[%c0_142, %c0_143, %c0_144] : memref<2x2x32xf32, #tpu.memory_space<vmem>>, vector<2x2x32xf32>
      tpu.vector_store %arg18[%c0_142, %c0_143, %c0_144], %186 {strides = array<i32>} : memref<2x2x32xf32, #tpu.memory_space<vmem>>, vector<2x2x32xf32>,
    } else {
    }
    %c0 = arith.constant 0 : index
    %c0_1 = arith.constant 0 : index
    %c0_2 = arith.constant 0 : index
    %3 = vector.load %arg18[%c0, %c0_1, %c0_2] : memref<2x2x32xf32, #tpu.memory_space<vmem>>, vector<2x2x32xf32>
    %cst = arith.constant dense<0.000000e+00> : vector<2x32xf32>
    %4 = vector.multi_reduction <add>, %3, %cst [0] : vector<2x2x32xf32> to vector<2x32xf32>
    %c0_3 = arith.constant 0 : index
    %c0_4 = arith.constant 0 : index
    %5 = vector.load %arg4[%c0_3, %c0_4] : memref<32x32xf32, #tpu.memory_space<vmem>>, vector<32x32xf32>
    %cst_5 = arith.constant dense<0.000000e+00> : vector<2x32xf32>
    %6 = tpu.matmul %4, %5, %cst_5 {dimension_numbers = #tpu.dot_dimension_numbers<[1], [0], [0], [1], [0, 0, 1, 1], [], []>} : vector<2x32xf32>, vector<32x32xf32>, vector<2x32xf32> -> vector<2x32xf32>
    %c0_6 = arith.constant 0 : index
    %c0_7 = arith.constant 0 : index
    %7 = vector.load %arg5[%c0_6, %c0_7] : memref<1x32xf32, #tpu.memory_space<vmem>>, vector<1x32xf32>
    %8 = vector.broadcast %7 : vector<1x32xf32> to vector<2x32xf32>
    %9 = arith.addf %6, %8 : vector<2x32xf32>
    %c0_8 = arith.constant 0 : index
    %c0_9 = arith.constant 0 : index
    %c0_10 = arith.constant 0 : index
    %10 = vector.load %arg2[%c0_8, %c0_9, %c0_10] : memref<2x8x32xf32, #tpu.memory_space<vmem>>, vector<2x8x32xf32>
    %11 = vector.shape_cast %9 : vector<2x32xf32> to vector<2x1x32xf32>
    %12 = vector.broadcast %11 : vector<2x1x32xf32> to vector<2x8x32xf32>
    %13 = arith.addf %10, %12 : vector<2x8x32xf32>
    %cst_11 = arith.constant 0.000000e+00 : f32
    %14 = vector.broadcast %cst_11 : f32 to vector<2x8x32xf32>
    %15 = arith.maximumf %13, %14 : vector<2x8x32xf32>
    %c0_12 = arith.constant 0 : index
    %c0_13 = arith.constant 0 : index
    %16 = vector.load %arg6[%c0_12, %c0_13] : memref<1x32xf32, #tpu.memory_space<vmem>>, vector<1x32xf32>
    %17 = vector.shape_cast %16 : vector<1x32xf32> to vector<1x1x32xf32>
    %18 = vector.broadcast %17 : vector<1x1x32xf32> to vector<2x8x32xf32>
    %19 = arith.mulf %15, %18 : vector<2x8x32xf32>
    %cst_14 = arith.constant dense<0.000000e+00> : vector<2x8xf32>
    %20 = vector.multi_reduction <add>, %19, %cst_14 [2] : vector<2x8x32xf32> to vector<2x8xf32>
    %21 = vector.shape_cast %20 : vector<2x8xf32> to vector<2x8x1xf32>
    %cst_15 = arith.constant dense<0xFF800000> : vector<2x1xf32>
    %22 = vector.multi_reduction <maximumf>, %21, %cst_15 [1] : vector<2x8x1xf32> to vector<2x1xf32>
    %23 = vector.shape_cast %22 : vector<2x1xf32> to vector<2x1x1xf32>
    %24 = vector.broadcast %23 : vector<2x1x1xf32> to vector<2x8x1xf32>
    %25 = arith.subf %21, %24 : vector<2x8x1xf32>
    %26 = math.exp %25 : vector<2x8x1xf32>
    %cst_16 = arith.constant dense<0.000000e+00> : vector<2x1xf32>
    %27 = vector.multi_reduction <add>, %26, %cst_16 [1] : vector<2x8x1xf32> to vector<2x1xf32>
    %28 = vector.shape_cast %27 : vector<2x1xf32> to vector<2x1x1xf32>
    %29 = vector.broadcast %28 : vector<2x1x1xf32> to vector<2x8x1xf32>
    %30 = arith.divf %26, %29 : vector<2x8x1xf32>
    %c0_17 = arith.constant 0 : index
    %c0_18 = arith.constant 0 : index
    %c0_19 = arith.constant 0 : index
    %31 = vector.load %arg3[%c0_17, %c0_18, %c0_19] : memref<2x8x32xf32, #tpu.memory_space<vmem>>, vector<2x8x32xf32>
    %32 = vector.broadcast %30 : vector<2x8x1xf32> to vector<2x8x32xf32>
    %33 = arith.mulf %32, %31 : vector<2x8x32xf32>
    %cst_20 = arith.constant dense<0.000000e+00> : vector<2x32xf32>
    %34 = vector.multi_reduction <add>, %33, %cst_20 [1] : vector<2x8x32xf32> to vector<2x32xf32>
    %c0_21 = arith.constant 0 : index
    %c0_22 = arith.constant 0 : index
    %c0_23 = arith.constant 0 : index
    %35 = vector.load %arg1[%c0_21, %c0_22, %c0_23] : memref<1x2x16xf32, #tpu.memory_space<vmem>>, vector<1x2x16xf32>
    %36 = vector.shape_cast %35 : vector<1x2x16xf32> to vector<2x16xf32>
    %c0_24 = arith.constant 0 : index
    %c0_25 = arith.constant 0 : index
    %c0_26 = arith.constant 0 : index
    %37 = vector.load %arg8[%c0_24, %c0_25, %c0_26] : memref<3x16x32xf32, #tpu.memory_space<vmem>>, vector<1x16x32xf32>
    %38 = vector.shape_cast %37 : vector<1x16x32xf32> to vector<16x32xf32>
    %cst_27 = arith.constant dense<0.000000e+00> : vector<2x32xf32>
    %39 = tpu.matmul %36, %38, %cst_27 {dimension_numbers = #tpu.dot_dimension_numbers<[1], [0], [0], [1], [0, 0, 1, 1], [], []>} : vector<2x16xf32>, vector<16x32xf32>, vector<2x32xf32> -> vector<2x32xf32>
    %c0_28 = arith.constant 0 : index
    %c0_29 = arith.constant 0 : index
    %c0_30 = arith.constant 0 : index
    %40 = vector.load %arg9[%c0_28, %c0_29, %c0_30] : memref<3x32x32xf32, #tpu.memory_space<vmem>>, vector<1x32x32xf32>
    %41 = vector.shape_cast %40 : vector<1x32x32xf32> to vector<32x32xf32>
    %cst_31 = arith.constant dense<0.000000e+00> : vector<2x32xf32>
    %42 = tpu.matmul %34, %41, %cst_31 {dimension_numbers = #tpu.dot_dimension_numbers<[1], [0], [0], [1], [0, 0, 1, 1], [], []>} : vector<2x32xf32>, vector<32x32xf32>, vector<2x32xf32> -> vector<2x32xf32>
    %43 = arith.addf %39, %42 : vector<2x32xf32>
    %c0_32 = arith.constant 0 : index
    %c0_33 = arith.constant 0 : index
    %c0_34 = arith.constant 0 : index
    %44 = vector.load %arg11[%c0_32, %c0_33, %c0_34] : memref<3x1x32xf32, #tpu.memory_space<vmem>>, vector<1x1x32xf32>
    %45 = vector.shape_cast %44 : vector<1x1x32xf32> to vector<1x32xf32>
    %46 = vector.broadcast %45 : vector<1x32xf32> to vector<2x32xf32>
    %47 = arith.addf %43, %46 : vector<2x32xf32>
    %c1 = arith.constant 1 : index
    %c0_35 = arith.constant 0 : index
    %c0_36 = arith.constant 0 : index
    %48 = vector.load %arg8[%c1, %c0_35, %c0_36] : memref<3x16x32xf32, #tpu.memory_space<vmem>>, vector<1x16x32xf32>
    %49 = vector.shape_cast %48 : vector<1x16x32xf32> to vector<16x32xf32>
    %cst_37 = arith.constant dense<0.000000e+00> : vector<2x32xf32>
    %50 = tpu.matmul %36, %49, %cst_37 {dimension_numbers = #tpu.dot_dimension_numbers<[1], [0], [0], [1], [0, 0, 1, 1], [], []>} : vector<2x16xf32>, vector<16x32xf32>, vector<2x32xf32> -> vector<2x32xf32>
    %c1_38 = arith.constant 1 : index
    %c0_39 = arith.constant 0 : index
    %c0_40 = arith.constant 0 : index
    %51 = vector.load %arg9[%c1_38, %c0_39, %c0_40] : memref<3x32x32xf32, #tpu.memory_space<vmem>>, vector<1x32x32xf32>
    %52 = vector.shape_cast %51 : vector<1x32x32xf32> to vector<32x32xf32>
    %cst_41 = arith.constant dense<0.000000e+00> : vector<2x32xf32>
    %53 = tpu.matmul %34, %52, %cst_41 {dimension_numbers = #tpu.dot_dimension_numbers<[1], [0], [0], [1], [0, 0, 1, 1], [], []>} : vector<2x32xf32>, vector<32x32xf32>, vector<2x32xf32> -> vector<2x32xf32>
    %54 = arith.addf %50, %53 : vector<2x32xf32>
    %c1_42 = arith.constant 1 : index
    %c0_43 = arith.constant 0 : index
    %c0_44 = arith.constant 0 : index
    %55 = vector.load %arg11[%c1_42, %c0_43, %c0_44] : memref<3x1x32xf32, #tpu.memory_space<vmem>>, vector<1x1x32xf32>
    %56 = vector.shape_cast %55 : vector<1x1x32xf32> to vector<1x32xf32>
    %57 = vector.broadcast %56 : vector<1x32xf32> to vector<2x32xf32>
    %58 = arith.addf %54, %57 : vector<2x32xf32>
    %c2 = arith.constant 2 : index
    %c0_45 = arith.constant 0 : index
    %c0_46 = arith.constant 0 : index
    %59 = vector.load %arg8[%c2, %c0_45, %c0_46] : memref<3x16x32xf32, #tpu.memory_space<vmem>>, vector<1x16x32xf32>
    %60 = vector.shape_cast %59 : vector<1x16x32xf32> to vector<16x32xf32>
    %cst_47 = arith.constant dense<0.000000e+00> : vector<2x32xf32>
    %61 = tpu.matmul %36, %60, %cst_47 {dimension_numbers = #tpu.dot_dimension_numbers<[1], [0], [0], [1], [0, 0, 1, 1], [], []>} : vector<2x16xf32>, vector<16x32xf32>, vector<2x32xf32> -> vector<2x32xf32>
    %c2_48 = arith.constant 2 : index
    %c0_49 = arith.constant 0 : index
    %c0_50 = arith.constant 0 : index
    %62 = vector.load %arg9[%c2_48, %c0_49, %c0_50] : memref<3x32x32xf32, #tpu.memory_space<vmem>>, vector<1x32x32xf32>
    %63 = vector.shape_cast %62 : vector<1x32x32xf32> to vector<32x32xf32>
    %cst_51 = arith.constant dense<0.000000e+00> : vector<2x32xf32>
    %64 = tpu.matmul %34, %63, %cst_51 {dimension_numbers = #tpu.dot_dimension_numbers<[1], [0], [0], [1], [0, 0, 1, 1], [], []>} : vector<2x32xf32>, vector<32x32xf32>, vector<2x32xf32> -> vector<2x32xf32>
    %65 = arith.addf %61, %64 : vector<2x32xf32>
    %c2_52 = arith.constant 2 : index
    %c0_53 = arith.constant 0 : index
    %c0_54 = arith.constant 0 : index
    %66 = vector.load %arg11[%c2_52, %c0_53, %c0_54] : memref<3x1x32xf32, #tpu.memory_space<vmem>>, vector<1x1x32xf32>
    %67 = vector.shape_cast %66 : vector<1x1x32xf32> to vector<1x32xf32>
    %68 = vector.broadcast %67 : vector<1x32xf32> to vector<2x32xf32>
    %69 = arith.addf %65, %68 : vector<2x32xf32>
    %c0_55 = arith.constant 0 : index
    %c0_56 = arith.constant 0 : index
    %c0_57 = arith.constant 0 : index
    %70 = vector.load %arg18[%c0_55, %c0_56, %c0_57] : memref<2x2x32xf32, #tpu.memory_space<vmem>>, vector<1x2x32xf32>
    %71 = vector.shape_cast %70 : vector<1x2x32xf32> to vector<2x32xf32>
    %c0_58 = arith.constant 0 : index
    %c0_59 = arith.constant 0 : index
    %c0_60 = arith.constant 0 : index
    %72 = vector.load %arg10[%c0_58, %c0_59, %c0_60] : memref<3x32x32xf32, #tpu.memory_space<vmem>>, vector<1x32x32xf32>
    %73 = vector.shape_cast %72 : vector<1x32x32xf32> to vector<32x32xf32>
    %cst_61 = arith.constant dense<0.000000e+00> : vector<2x32xf32>
    %74 = tpu.matmul %71, %73, %cst_61 {dimension_numbers = #tpu.dot_dimension_numbers<[1], [0], [0], [1], [0, 0, 1, 1], [], []>} : vector<2x32xf32>, vector<32x32xf32>, vector<2x32xf32> -> vector<2x32xf32>
    %c0_62 = arith.constant 0 : index
    %c0_63 = arith.constant 0 : index
    %c0_64 = arith.constant 0 : index
    %75 = vector.load %arg12[%c0_62, %c0_63, %c0_64] : memref<3x1x32xf32, #tpu.memory_space<vmem>>, vector<1x1x32xf32>
    %76 = vector.shape_cast %75 : vector<1x1x32xf32> to vector<1x32xf32>
    %77 = vector.broadcast %76 : vector<1x32xf32> to vector<2x32xf32>
    %78 = arith.addf %74, %77 : vector<2x32xf32>
    %c1_65 = arith.constant 1 : index
    %c0_66 = arith.constant 0 : index
    %c0_67 = arith.constant 0 : index
    %79 = vector.load %arg10[%c1_65, %c0_66, %c0_67] : memref<3x32x32xf32, #tpu.memory_space<vmem>>, vector<1x32x32xf32>
    %80 = vector.shape_cast %79 : vector<1x32x32xf32> to vector<32x32xf32>
    %cst_68 = arith.constant dense<0.000000e+00> : vector<2x32xf32>
    %81 = tpu.matmul %71, %80, %cst_68 {dimension_numbers = #tpu.dot_dimension_numbers<[1], [0], [0], [1], [0, 0, 1, 1], [], []>} : vector<2x32xf32>, vector<32x32xf32>, vector<2x32xf32> -> vector<2x32xf32>
    %c1_69 = arith.constant 1 : index
    %c0_70 = arith.constant 0 : index
    %c0_71 = arith.constant 0 : index
    %82 = vector.load %arg12[%c1_69, %c0_70, %c0_71] : memref<3x1x32xf32, #tpu.memory_space<vmem>>, vector<1x1x32xf32>
    %83 = vector.shape_cast %82 : vector<1x1x32xf32> to vector<1x32xf32>
    %84 = vector.broadcast %83 : vector<1x32xf32> to vector<2x32xf32>
    %85 = arith.addf %81, %84 : vector<2x32xf32>
    %c2_72 = arith.constant 2 : index
    %c0_73 = arith.constant 0 : index
    %c0_74 = arith.constant 0 : index
    %86 = vector.load %arg10[%c2_72, %c0_73, %c0_74] : memref<3x32x32xf32, #tpu.memory_space<vmem>>, vector<1x32x32xf32>
    %87 = vector.shape_cast %86 : vector<1x32x32xf32> to vector<32x32xf32>
    %cst_75 = arith.constant dense<0.000000e+00> : vector<2x32xf32>
    %88 = tpu.matmul %71, %87, %cst_75 {dimension_numbers = #tpu.dot_dimension_numbers<[1], [0], [0], [1], [0, 0, 1, 1], [], []>} : vector<2x32xf32>, vector<32x32xf32>, vector<2x32xf32> -> vector<2x32xf32>
    %c2_76 = arith.constant 2 : index
    %c0_77 = arith.constant 0 : index
    %c0_78 = arith.constant 0 : index
    %89 = vector.load %arg12[%c2_76, %c0_77, %c0_78] : memref<3x1x32xf32, #tpu.memory_space<vmem>>, vector<1x1x32xf32>
    %90 = vector.shape_cast %89 : vector<1x1x32xf32> to vector<1x32xf32>
    %91 = vector.broadcast %90 : vector<1x32xf32> to vector<2x32xf32>
    %92 = arith.addf %88, %91 : vector<2x32xf32>
    %93 = arith.addf %47, %78 : vector<2x32xf32>
    %94 = arith.negf %93 : vector<2x32xf32>
    %95 = math.exp %94 : vector<2x32xf32>
    %cst_79 = arith.constant 1.000000e+00 : f32
    %96 = vector.broadcast %cst_79 : f32 to vector<2x32xf32>
    %97 = arith.addf %96, %95 : vector<2x32xf32>
    %98 = arith.divf %96, %97 : vector<2x32xf32>
    %99 = arith.addf %58, %85 : vector<2x32xf32>
    %100 = arith.negf %99 : vector<2x32xf32>
    %101 = math.exp %100 : vector<2x32xf32>
    %cst_80 = arith.constant 1.000000e+00 : f32
    %102 = vector.broadcast %cst_80 : f32 to vector<2x32xf32>
    %103 = arith.addf %102, %101 : vector<2x32xf32>
    %104 = arith.divf %102, %103 : vector<2x32xf32>
    %105 = arith.mulf %98, %92 : vector<2x32xf32>
    %106 = arith.addf %69, %105 : vector<2x32xf32>
    %107 = math.tanh %106 : vector<2x32xf32>
    %cst_81 = arith.constant 1.000000e+00 : f32
    %108 = vector.broadcast %cst_81 : f32 to vector<2x32xf32>
    %109 = arith.subf %108, %104 : vector<2x32xf32>
    %110 = arith.mulf %109, %107 : vector<2x32xf32>
    %111 = arith.mulf %104, %71 : vector<2x32xf32>
    %112 = arith.addf %110, %111 : vector<2x32xf32>
    %c0_82 = arith.constant 0 : index
    %c0_83 = arith.constant 0 : index
    %c0_84 = arith.constant 0 : index
    %113 = vector.load %arg18[%c0_82, %c0_83, %c0_84] : memref<2x2x32xf32, #tpu.memory_space<vmem>>, vector<1x2x32xf32>
    %114 = vector.shape_cast %113 : vector<1x2x32xf32> to vector<2x32xf32>
    %115 = vector.shape_cast %112 : vector<2x32xf32> to vector<1x2x32xf32>
    tpu.vector_store %arg18[%c0_82, %c0_83, %c0_84], %115 {strides = array<i32>} : memref<2x2x32xf32, #tpu.memory_space<vmem>>, vector<1x2x32xf32>,
    %c0_85 = arith.constant 0 : index
    %c0_86 = arith.constant 0 : index
    %c0_87 = arith.constant 0 : index
    %116 = vector.load %arg13[%c0_85, %c0_86, %c0_87] : memref<3x32x32xf32, #tpu.memory_space<vmem>>, vector<1x32x32xf32>
    %117 = vector.shape_cast %116 : vector<1x32x32xf32> to vector<32x32xf32>
    %cst_88 = arith.constant dense<0.000000e+00> : vector<2x32xf32>
    %118 = tpu.matmul %112, %117, %cst_88 {dimension_numbers = #tpu.dot_dimension_numbers<[1], [0], [0], [1], [0, 0, 1, 1], [], []>} : vector<2x32xf32>, vector<32x32xf32>, vector<2x32xf32> -> vector<2x32xf32>
    %c0_89 = arith.constant 0 : index
    %c0_90 = arith.constant 0 : index
    %c0_91 = arith.constant 0 : index
    %119 = vector.load %arg15[%c0_89, %c0_90, %c0_91] : memref<3x1x32xf32, #tpu.memory_space<vmem>>, vector<1x1x32xf32>
    %120 = vector.shape_cast %119 : vector<1x1x32xf32> to vector<1x32xf32>
    %121 = vector.broadcast %120 : vector<1x32xf32> to vector<2x32xf32>
    %122 = arith.addf %118, %121 : vector<2x32xf32>
    %c1_92 = arith.constant 1 : index
    %c0_93 = arith.constant 0 : index
    %c0_94 = arith.constant 0 : index
    %123 = vector.load %arg13[%c1_92, %c0_93, %c0_94] : memref<3x32x32xf32, #tpu.memory_space<vmem>>, vector<1x32x32xf32>
    %124 = vector.shape_cast %123 : vector<1x32x32xf32> to vector<32x32xf32>
    %cst_95 = arith.constant dense<0.000000e+00> : vector<2x32xf32>
    %125 = tpu.matmul %112, %124, %cst_95 {dimension_numbers = #tpu.dot_dimension_numbers<[1], [0], [0], [1], [0, 0, 1, 1], [], []>} : vector<2x32xf32>, vector<32x32xf32>, vector<2x32xf32> -> vector<2x32xf32>
    %c1_96 = arith.constant 1 : index
    %c0_97 = arith.constant 0 : index
    %c0_98 = arith.constant 0 : index
    %126 = vector.load %arg15[%c1_96, %c0_97, %c0_98] : memref<3x1x32xf32, #tpu.memory_space<vmem>>, vector<1x1x32xf32>
    %127 = vector.shape_cast %126 : vector<1x1x32xf32> to vector<1x32xf32>
    %128 = vector.broadcast %127 : vector<1x32xf32> to vector<2x32xf32>
    %129 = arith.addf %125, %128 : vector<2x32xf32>
    %c2_99 = arith.constant 2 : index
    %c0_100 = arith.constant 0 : index
    %c0_101 = arith.constant 0 : index
    %130 = vector.load %arg13[%c2_99, %c0_100, %c0_101] : memref<3x32x32xf32, #tpu.memory_space<vmem>>, vector<1x32x32xf32>
    %131 = vector.shape_cast %130 : vector<1x32x32xf32> to vector<32x32xf32>
    %cst_102 = arith.constant dense<0.000000e+00> : vector<2x32xf32>
    %132 = tpu.matmul %112, %131, %cst_102 {dimension_numbers = #tpu.dot_dimension_numbers<[1], [0], [0], [1], [0, 0, 1, 1], [], []>} : vector<2x32xf32>, vector<32x32xf32>, vector<2x32xf32> -> vector<2x32xf32>
    %c2_103 = arith.constant 2 : index
    %c0_104 = arith.constant 0 : index
    %c0_105 = arith.constant 0 : index
    %133 = vector.load %arg15[%c2_103, %c0_104, %c0_105] : memref<3x1x32xf32, #tpu.memory_space<vmem>>, vector<1x1x32xf32>
    %134 = vector.shape_cast %133 : vector<1x1x32xf32> to vector<1x32xf32>
    %135 = vector.broadcast %134 : vector<1x32xf32> to vector<2x32xf32>
    %136 = arith.addf %132, %135 : vector<2x32xf32>
    %c1_106 = arith.constant 1 : index
    %c0_107 = arith.constant 0 : index
    %c0_108 = arith.constant 0 : index
    %137 = vector.load %arg18[%c1_106, %c0_107, %c0_108] : memref<2x2x32xf32, #tpu.memory_space<vmem>>, vector<1x2x32xf32>
    %138 = vector.shape_cast %137 : vector<1x2x32xf32> to vector<2x32xf32>
    %c0_109 = arith.constant 0 : index
    %c0_110 = arith.constant 0 : index
    %c0_111 = arith.constant 0 : index
    %139 = vector.load %arg14[%c0_109, %c0_110, %c0_111] : memref<3x32x32xf32, #tpu.memory_space<vmem>>, vector<1x32x32xf32>
    %140 = vector.shape_cast %139 : vector<1x32x32xf32> to vector<32x32xf32>
    %cst_112 = arith.constant dense<0.000000e+00> : vector<2x32xf32>
    %141 = tpu.matmul %138, %140, %cst_112 {dimension_numbers = #tpu.dot_dimension_numbers<[1], [0], [0], [1], [0, 0, 1, 1], [], []>} : vector<2x32xf32>, vector<32x32xf32>, vector<2x32xf32> -> vector<2x32xf32>
    %c0_113 = arith.constant 0 : index
    %c0_114 = arith.constant 0 : index
    %c0_115 = arith.constant 0 : index
    %142 = vector.load %arg16[%c0_113, %c0_114, %c0_115] : memref<3x1x32xf32, #tpu.memory_space<vmem>>, vector<1x1x32xf32>
    %143 = vector.shape_cast %142 : vector<1x1x32xf32> to vector<1x32xf32>
    %144 = vector.broadcast %143 : vector<1x32xf32> to vector<2x32xf32>
    %145 = arith.addf %141, %144 : vector<2x32xf32>
    %c1_116 = arith.constant 1 : index
    %c0_117 = arith.constant 0 : index
    %c0_118 = arith.constant 0 : index
    %146 = vector.load %arg14[%c1_116, %c0_117, %c0_118] : memref<3x32x32xf32, #tpu.memory_space<vmem>>, vector<1x32x32xf32>
    %147 = vector.shape_cast %146 : vector<1x32x32xf32> to vector<32x32xf32>
    %cst_119 = arith.constant dense<0.000000e+00> : vector<2x32xf32>
    %148 = tpu.matmul %138, %147, %cst_119 {dimension_numbers = #tpu.dot_dimension_numbers<[1], [0], [0], [1], [0, 0, 1, 1], [], []>} : vector<2x32xf32>, vector<32x32xf32>, vector<2x32xf32> -> vector<2x32xf32>
    %c1_120 = arith.constant 1 : index
    %c0_121 = arith.constant 0 : index
    %c0_122 = arith.constant 0 : index
    %149 = vector.load %arg16[%c1_120, %c0_121, %c0_122] : memref<3x1x32xf32, #tpu.memory_space<vmem>>, vector<1x1x32xf32>
    %150 = vector.shape_cast %149 : vector<1x1x32xf32> to vector<1x32xf32>
    %151 = vector.broadcast %150 : vector<1x32xf32> to vector<2x32xf32>
    %152 = arith.addf %148, %151 : vector<2x32xf32>
    %c2_123 = arith.constant 2 : index
    %c0_124 = arith.constant 0 : index
    %c0_125 = arith.constant 0 : index
    %153 = vector.load %arg14[%c2_123, %c0_124, %c0_125] : memref<3x32x32xf32, #tpu.memory_space<vmem>>, vector<1x32x32xf32>
    %154 = vector.shape_cast %153 : vector<1x32x32xf32> to vector<32x32xf32>
    %cst_126 = arith.constant dense<0.000000e+00> : vector<2x32xf32>
    %155 = tpu.matmul %138, %154, %cst_126 {dimension_numbers = #tpu.dot_dimension_numbers<[1], [0], [0], [1], [0, 0, 1, 1], [], []>} : vector<2x32xf32>, vector<32x32xf32>, vector<2x32xf32> -> vector<2x32xf32>
    %c2_127 = arith.constant 2 : index
    %c0_128 = arith.constant 0 : index
    %c0_129 = arith.constant 0 : index
    %156 = vector.load %arg16[%c2_127, %c0_128, %c0_129] : memref<3x1x32xf32, #tpu.memory_space<vmem>>, vector<1x1x32xf32>
    %157 = vector.shape_cast %156 : vector<1x1x32xf32> to vector<1x32xf32>
    %158 = vector.broadcast %157 : vector<1x32xf32> to vector<2x32xf32>
    %159 = arith.addf %155, %158 : vector<2x32xf32>
    %160 = arith.addf %122, %145 : vector<2x32xf32>
    %161 = arith.negf %160 : vector<2x32xf32>
    %162 = math.exp %161 : vector<2x32xf32>
    %cst_130 = arith.constant 1.000000e+00 : f32
    %163 = vector.broadcast %cst_130 : f32 to vector<2x32xf32>
    %164 = arith.addf %163, %162 : vector<2x32xf32>
    %165 = arith.divf %163, %164 : vector<2x32xf32>
    %166 = arith.addf %129, %152 : vector<2x32xf32>
    %167 = arith.negf %166 : vector<2x32xf32>
    %168 = math.exp %167 : vector<2x32xf32>
    %cst_131 = arith.constant 1.000000e+00 : f32
    %169 = vector.broadcast %cst_131 : f32 to vector<2x32xf32>
    %170 = arith.addf %169, %168 : vector<2x32xf32>
    %171 = arith.divf %169, %170 : vector<2x32xf32>
    %172 = arith.mulf %165, %159 : vector<2x32xf32>
    %173 = arith.addf %136, %172 : vector<2x32xf32>
    %174 = math.tanh %173 : vector<2x32xf32>
    %cst_132 = arith.constant 1.000000e+00 : f32
    %175 = vector.broadcast %cst_132 : f32 to vector<2x32xf32>
    %176 = arith.subf %175, %171 : vector<2x32xf32>
    %177 = arith.mulf %176, %174 : vector<2x32xf32>
    %178 = arith.mulf %171, %138 : vector<2x32xf32>
    %179 = arith.addf %177, %178 : vector<2x32xf32>
    %c1_133 = arith.constant 1 : index
    %c0_134 = arith.constant 0 : index
    %c0_135 = arith.constant 0 : index
    %180 = vector.load %arg18[%c1_133, %c0_134, %c0_135] : memref<2x2x32xf32, #tpu.memory_space<vmem>>, vector<1x2x32xf32>
    %181 = vector.shape_cast %180 : vector<1x2x32xf32> to vector<2x32xf32>
    %182 = vector.shape_cast %179 : vector<2x32xf32> to vector<1x2x32xf32>
    tpu.vector_store %arg18[%c1_133, %c0_134, %c0_135], %182 {strides = array<i32>} : memref<2x2x32xf32, #tpu.memory_space<vmem>>, vector<1x2x32xf32>,
    %c0_136 = arith.constant 0 : index
    %c0_137 = arith.constant 0 : index
    %c0_138 = arith.constant 0 : index
    %183 = vector.load %arg17[%c0_136, %c0_137, %c0_138] : memref<1x2x32xf32, #tpu.memory_space<vmem>>, vector<1x2x32xf32>
    %184 = vector.shape_cast %183 : vector<1x2x32xf32> to vector<2x32xf32>
    %185 = vector.shape_cast %179 : vector<2x32xf32> to vector<1x2x32xf32>
    tpu.vector_store %arg17[%c0_136, %c0_137, %c0_138], %185 {strides = array<i32>} : memref<1x2x32xf32, #tpu.memory_space<vmem>>, vector<1x2x32xf32>,
    return
  }
  func.func @transform_0(%arg0: i32) -> (i32, i32, i32) {
    %c0_i32 = arith.constant 0 : i32
    %c0_i32_0 = arith.constant 0 : i32
    %c0_i32_1 = arith.constant 0 : i32
    return %arg0, %c0_i32, %c0_i32_0 : i32, i32, i32
  }
  func.func @transform_1(%arg0: i32) -> (i32, i32, i32) {
    %c0_i32 = arith.constant 0 : i32
    %c0_i32_0 = arith.constant 0 : i32
    %c0_i32_1 = arith.constant 0 : i32
    %c0_i32_2 = arith.constant 0 : i32
    return %c0_i32, %c0_i32_0, %c0_i32_1 : i32, i32, i32
  }
  func.func @transform_2(%arg0: i32) -> (i32, i32, i32) {
    %c0_i32 = arith.constant 0 : i32
    %c0_i32_0 = arith.constant 0 : i32
    %c0_i32_1 = arith.constant 0 : i32
    %c0_i32_2 = arith.constant 0 : i32
    return %c0_i32, %c0_i32_0, %c0_i32_1 : i32, i32, i32
  }
  func.func @transform_3(%arg0: i32) -> (i32, i32) {
    %c0_i32 = arith.constant 0 : i32
    %c0_i32_0 = arith.constant 0 : i32
    %c0_i32_1 = arith.constant 0 : i32
    return %c0_i32, %c0_i32_0 : i32, i32
  }
  func.func @transform_4(%arg0: i32) -> (i32, i32) {
    %c0_i32 = arith.constant 0 : i32
    %c0_i32_0 = arith.constant 0 : i32
    %c0_i32_1 = arith.constant 0 : i32
    return %c0_i32, %c0_i32_0 : i32, i32
  }
  func.func @transform_5(%arg0: i32) -> (i32, i32) {
    %c0_i32 = arith.constant 0 : i32
    %c0_i32_0 = arith.constant 0 : i32
    %c0_i32_1 = arith.constant 0 : i32
    return %c0_i32, %c0_i32_0 : i32, i32
  }
  func.func @transform_6(%arg0: i32) -> (i32, i32, i32) {
    %c0_i32 = arith.constant 0 : i32
    %c0_i32_0 = arith.constant 0 : i32
    %c0_i32_1 = arith.constant 0 : i32
    %c0_i32_2 = arith.constant 0 : i32
    return %c0_i32, %c0_i32_0, %c0_i32_1 : i32, i32, i32
  }
  func.func @transform_7(%arg0: i32) -> (i32, i32, i32) {
    %c0_i32 = arith.constant 0 : i32
    %c0_i32_0 = arith.constant 0 : i32
    %c0_i32_1 = arith.constant 0 : i32
    %c0_i32_2 = arith.constant 0 : i32
    return %c0_i32, %c0_i32_0, %c0_i32_1 : i32, i32, i32
  }
  func.func @transform_8(%arg0: i32) -> (i32, i32, i32) {
    %c0_i32 = arith.constant 0 : i32
    %c0_i32_0 = arith.constant 0 : i32
    %c0_i32_1 = arith.constant 0 : i32
    %c0_i32_2 = arith.constant 0 : i32
    return %c0_i32, %c0_i32_0, %c0_i32_1 : i32, i32, i32
  }
  func.func @transform_9(%arg0: i32) -> (i32, i32, i32) {
    %c0_i32 = arith.constant 0 : i32
    %c0_i32_0 = arith.constant 0 : i32
    %c0_i32_1 = arith.constant 0 : i32
    %c0_i32_2 = arith.constant 0 : i32
    return %c0_i32, %c0_i32_0, %c0_i32_1 : i32, i32, i32
  }
  func.func @transform_10(%arg0: i32) -> (i32, i32, i32) {
    %c0_i32 = arith.constant 0 : i32
    %c0_i32_0 = arith.constant 0 : i32
    %c0_i32_1 = arith.constant 0 : i32
    %c0_i32_2 = arith.constant 0 : i32
    return %c0_i32, %c0_i32_0, %c0_i32_1 : i32, i32, i32
  }
  func.func @transform_11(%arg0: i32) -> (i32, i32, i32) {
    %c0_i32 = arith.constant 0 : i32
    %c0_i32_0 = arith.constant 0 : i32
    %c0_i32_1 = arith.constant 0 : i32
    %c0_i32_2 = arith.constant 0 : i32
    return %c0_i32, %c0_i32_0, %c0_i32_1 : i32, i32, i32
  }
  func.func @transform_12(%arg0: i32) -> (i32, i32, i32) {
    %c0_i32 = arith.constant 0 : i32
    %c0_i32_0 = arith.constant 0 : i32
    %c0_i32_1 = arith.constant 0 : i32
    %c0_i32_2 = arith.constant 0 : i32
    return %c0_i32, %c0_i32_0, %c0_i32_1 : i32, i32, i32
  }
  func.func @transform_13(%arg0: i32) -> (i32, i32, i32) {
    %c0_i32 = arith.constant 0 : i32
    %c0_i32_0 = arith.constant 0 : i32
    %c0_i32_1 = arith.constant 0 : i32
    %c0_i32_2 = arith.constant 0 : i32
    return %c0_i32, %c0_i32_0, %c0_i32_1 : i32, i32, i32
  }
  func.func @transform_14(%arg0: i32) -> (i32, i32, i32) {
    %c0_i32 = arith.constant 0 : i32
    %c0_i32_0 = arith.constant 0 : i32
    %c0_i32_1 = arith.constant 0 : i32
    %c0_i32_2 = arith.constant 0 : i32
    return %c0_i32, %c0_i32_0, %c0_i32_1 : i32, i32, i32
  }
  func.func @transform_15(%arg0: i32) -> (i32, i32, i32) {
    %c0_i32 = arith.constant 0 : i32
    %c0_i32_0 = arith.constant 0 : i32
    %c0_i32_1 = arith.constant 0 : i32
    %c0_i32_2 = arith.constant 0 : i32
    return %c0_i32, %c0_i32_0, %c0_i32_1 : i32, i32, i32
  }
  func.func @transform_16(%arg0: i32) -> (i32, i32, i32) {
    %c0_i32 = arith.constant 0 : i32
    %c0_i32_0 = arith.constant 0 : i32
    %c0_i32_1 = arith.constant 0 : i32
    return %arg0, %c0_i32, %c0_i32_0 : i32, i32, i32
  }
}

</mosaic_0001>

<bundles_post_ra>
// kernel: _lambda_.7
= control target key start
LH: loop header
LB: loop body
LE: loop exit
PB: predicated region body
PF: predicated region fallthrough
CT: control target
= control target key end

     0   :  { %v128_v2 = vmov 0.0   ;;  %vm30_vm0 = vcmask 64512   ;;  %v20_v5 = vlaneseq  ;;  %vm115_vm1 = vcmask 523264   ;;  %s176_s1 = inlined_call_operand.vmem [shape: f32[8,192], index: 1, kind: input, shape index: {}]   ;;  %s177_s0 = inlined_call_operand.vmem [shape: f32[16,8], index: 0, kind: input, shape index: {}]   ;;  %s178_s2 = inlined_call_operand.vmem [shape: f32[1,192], index: 2, kind: input, shape index: {}]   ;;  %s179_s3 = inlined_call_operand.vmem [shape: f32[16,192], index: 3, kind: output, shape index: {}]  }
   0x1   :  { %v17_v0 = vld [vmem:[%s176_s1 + $0x8] sm:$0xff]  ;;  %v16_v1 = vld [vmem:[%s176_s1] sm:$0xff]  ;;  %101 = vmatprep.mubr.f32.mxu0 %v128_v2  ;;  %107 = vmatprep.mubr.f32.mxu1 %v128_v2 }
   0x2   :  { %v14_v3 = vld [vmem:[%s177_s0] sm:$0xff]  ;;  %37 = vmatprep.subr.mxu0 %v17_v0  ;;  %125 = vmatprep.subr.mxu1 %v17_v0  ;;  %v15_v4 = vld [vmem:[%s177_s0 + $0x8] sm:$0xff]  ;;  %v21_v6 = vshrl.u32 %v20_v5, 7 }
   0x3   :  { %38 = vmatpush1.msra.mxu0 %v16_v1  ;;  %126 = vmatpush1.msra.mxu1 %v16_v1  ;;  %v18_v8 = vld [vmem:[%s178_s2] sm:$0x3] }
   0x4   :  { %123 = vmatmul.mubr.msk.f32.vlgmr.msra.gmra.mrb[0].mxu0 %vm30_vm0, %v14_v3  ;;  %124 = vmatmul.mubr.msk.f32.vlgmr.msra.gmra.mrb[0].mxu1 %vm30_vm0, %v15_v4  ;;  %v22_v7 = vsub.s32 0, %v21_v6  ;;  %v26_v9 = vsub.s32 1, %v21_v6 }
   0x6   :  { %v23_v10 = vrot.slane %v18_v8, %v22_v7  ;;  %v27_v11 = vrot.slane %v18_v8, %v26_v9 }
  0xd7   :  { %v103_v12 = vpop.f32.mrb[0].mxu0  ;;  %v109_v13 = vpop.f32.mrb[0].mxu1 }
  0xd8   :  { %v104_v14 = vadd.f32 %v103_v12, %v23_v10  ;;  %v110_v15 = vadd.f32 %v109_v13, %v23_v10  ;;  %v105_v16 = vpop.f32.mrb[1].mxu0  ;;  %v111_v17 = vpop.f32.mrb[1].mxu1 }
  0xd9   :  { %v106_v18 = vadd.f32 %v105_v16, %v27_v11  ;;  %v112_v19 = vadd.f32 %v111_v17, %v27_v11 }
  0xda   :  { %114 = vst [vmem:[%s179_s3] sm:$0xff] %v104_v14  ;;  %117 = vst [vmem:[%s179_s3 + $0x10] sm:$0xff] %v110_v15 }
  0xdb   :  { %116 = vst.msk [vmem:[%s179_s3 + $0x8] sm:$0xff] %vm115_vm1, %v106_v18  ;;  %118 = vst.msk [vmem:[%s179_s3 + $0x18] sm:$0xff] %vm115_vm1, %v112_v19 }

// kernel: _lambda_.9
= control target key start
LH: loop header
LB: loop body
LE: loop exit
PB: predicated region body
PF: predicated region fallthrough
CT: control target
= control target key end

     0   :  { %v163_v3 = vmov 0.0   ;;  %vm44_vm0 = vcmask 523264   ;;  %v34_v27 = vlaneseq  ;;  %s257_s1 = inlined_call_operand.vmem [shape: f32[64,192], index: 1, kind: input, shape index: {}]   ;;  %s258_s0 = inlined_call_operand.vmem [shape: f32[16,64], index: 0, kind: input, shape index: {}]   ;;  %s259_s2 = inlined_call_operand.vmem [shape: f32[1,192], index: 2, kind: input, shape index: {}]   ;;  %s260_s3 = inlined_call_operand.vmem [shape: f32[16,192], index: 3, kind: output, shape index: {}]  }
   0x1   :  { %v17_v0 = vld [vmem:[%s257_s1 + $0x8] sm:$0xff]  ;;  %v19_v1 = vld [vmem:[%s257_s1 + $0x18] sm:$0xff]  ;;  %v16_v2 = vld [vmem:[%s257_s1] sm:$0xff]  ;;  %115 = vmatprep.mubr.f32.mxu0 %v163_v3  ;;  %121 = vmatprep.mubr.f32.mxu1 %v163_v3 }
   0x2   :  { %v138_v4 = vpack.c.bf16 %v19_v1, %v17_v0  ;;  %v18_v5 = vld [vmem:[%s257_s1 + $0x10] sm:$0xff]  ;;  %v21_v6 = vld [vmem:[%s257_s1 + $0x28] sm:$0xff]  ;;  %v23_v7 = vld [vmem:[%s257_s1 + $0x38] sm:$0xff]  ;;  %v35_v28 = vshrl.u32 %v34_v27, 7 }
   0x3   :  { %v140_v8 = vpack.c.bf16 %v18_v5, %v16_v2  ;;  %v142_v9 = vpack.c.bf16 %v23_v7, %v21_v6  ;;  %v20_v10 = vld [vmem:[%s257_s1 + $0x20] sm:$0xff]  ;;  %v22_v11 = vld [vmem:[%s257_s1 + $0x30] sm:$0xff]  ;;  %v25_v12 = vld [vmem:[%s257_s1 + $0x48] sm:$0xff] }
   0x4   :  { %139 = vmatprep.subr.bf16.mxu0 %v138_v4  ;;  %154 = vmatprep.subr.bf16.mxu1 %v138_v4  ;;  %v27_v13 = vld [vmem:[%s257_s1 + $0x58] sm:$0xff]  ;;  %v144_v14 = vpack.c.bf16 %v22_v11, %v20_v10  ;;  %v24_v16 = vld [vmem:[%s257_s1 + $0x40] sm:$0xff]  ;;  %v26_v17 = vld [vmem:[%s257_s1 + $0x50] sm:$0xff]  ;;  %v36_v29 = vsub.s32 0, %v35_v28  ;;  %v40_v31 = vsub.s32 1, %v35_v28 }
   0x5   :  { %141 = vmatpush1.bf16.msra.mxu0 %v140_v8  ;;  %158 = vmatpush1.bf16.msra.mxu1 %v140_v8  ;;  %v146_v15 = vpack.c.bf16 %v27_v13, %v25_v12  ;;  %v29_v18 = vld [vmem:[%s257_s1 + $0x68] sm:$0xff]  ;;  %v31_v19 = vld [vmem:[%s257_s1 + $0x78] sm:$0xff]  ;;  %v148_v20 = vpack.c.bf16 %v26_v17, %v24_v16  ;;  %v28_v22 = vld [vmem:[%s257_s1 + $0x60] sm:$0xff] }
   0x6   :  { %143 = vmatprep.subr.bf16.mxu0 %v142_v9  ;;  %155 = vmatprep.subr.bf16.mxu1 %v142_v9  ;;  %v150_v21 = vpack.c.bf16 %v31_v19, %v29_v18  ;;  %v30_v23 = vld [vmem:[%s257_s1 + $0x70] sm:$0xff]  ;;  %v14_v25 = vld [vmem:[%s258_s0] sm:$0xff]  ;;  %v15_v26 = vld [vmem:[%s258_s0 + $0x8] sm:$0xff] }
   0x7   :  { %v152_v24 = vpack.c.bf16 %v30_v23, %v28_v22  ;;  %v32_v30 = vld [vmem:[%s259_s2] sm:$0x3] }
   0x8   :  { %v37_v32 = vrot.slane %v32_v30, %v36_v29  ;;  %v41_v33 = vrot.slane %v32_v30, %v40_v31 }
   0x9   :  { %145 = vmatpush1.bf16.msra.mxu0 %v144_v14  ;;  %159 = vmatpush1.bf16.msra.mxu1 %v144_v14 }
   0xa   :  { %147 = vmatprep.subr.bf16.mxu0 %v146_v15  ;;  %156 = vmatprep.subr.bf16.mxu1 %v146_v15 }
   0xd   :  { %149 = vmatpush1.bf16.msra.mxu0 %v148_v20  ;;  %160 = vmatpush1.bf16.msra.mxu1 %v148_v20 }
   0xe   :  { %151 = vmatprep.subr.bf16.mxu0 %v150_v21  ;;  %157 = vmatprep.subr.bf16.mxu1 %v150_v21 }
  0x11   :  { %153 = vmatpush1.bf16.msra.mxu0 %v152_v24  ;;  %161 = vmatpush1.bf16.msra.mxu1 %v152_v24 }
  0x14   :  { %136 = vmatmul.mubr.msk.f32.vlgmr.msra.gmra.mrb[0].mxu0 %vm44_vm0, %v14_v25  ;;  %137 = vmatmul.mubr.msk.f32.vlgmr.msra.gmra.mrb[0].mxu1 %vm44_vm0, %v15_v26 }
  0xe7   :  { %v117_v34 = vpop.f32.mrb[0].mxu0  ;;  %v123_v35 = vpop.f32.mrb[0].mxu1 }
  0xe8   :  { %v118_v36 = vadd.f32 %v117_v34, %v37_v32  ;;  %v124_v37 = vadd.f32 %v123_v35, %v37_v32  ;;  %v119_v38 = vpop.f32.mrb[1].mxu0  ;;  %v125_v39 = vpop.f32.mrb[1].mxu1 }
  0xe9   :  { %v120_v40 = vadd.f32 %v119_v38, %v41_v33  ;;  %v126_v41 = vadd.f32 %v125_v39, %v41_v33 }
  0xea   :  { %128 = vst [vmem:[%s260_s3] sm:$0xff] %v118_v36  ;;  %130 = vst [vmem:[%s260_s3 + $0x10] sm:$0xff] %v124_v37 }
  0xeb   :  { %129 = vst.msk [vmem:[%s260_s3 + $0x8] sm:$0xff] %vm44_vm0, %v120_v40  ;;  %131 = vst.msk [vmem:[%s260_s3 + $0x18] sm:$0xff] %vm44_vm0, %v126_v41 }

// kernel: _lambda_.8
= control target key start
LH: loop header
LB: loop body
LE: loop exit
PB: predicated region body
PF: predicated region fallthrough
CT: control target
= control target key end

     0   :  { %s929_s12 = smov 0   ;;  %s931_s13 = smov 0   ;;  %s1021_s0 = inlined_call_operand.vmem [shape: f32[2,8,3,2,32], index: 0, kind: input, shape index: {}]   ;;  %s1022_s1 = inlined_call_operand.vmem [shape: f32[2,3,32,32], index: 1, kind: input, shape index: {}]   ;;  %s1023_s2 = inlined_call_operand.vmem [shape: f32[2,3,1,32], index: 2, kind: input, shape index: {}]   ;;  %s1024_s3 = inlined_call_operand.vmem [shape: f32[2,8,2,32], index: 3, kind: output, shape index: {}]  }
   0x1   :  { %s933_s14 = smov 0   ;;  %s935_s15 = smov 0  }
   0x2   :  { %s937_s16 = smov 0  }
   0x3 LB: > { %s22_s17 = sadd.s32 1, %s895_s14  ;;  %s25_s18 = sadd.s32 1, %s899_s15  ;;  %s903_s16 = sphi %s937_s16, %s13_s16   ;;  %s899_s15 = sphi %s935_s15, %s1028_s15   ;;  %s895_s14 = sphi %s933_s14, %s1027_s14   ;;  %s891_s13 = sphi %s931_s13, %s1026_s13   ;;  %s887_s12 = sphi %s929_s12, %s1025_s12  }
   0x4   : > { %p23_p0 = scmp.ge.s32.totalorder %s22_s17, 8  ;;  %p711_p1 = scmp.ge.s32.totalorder %s903_s16, 1 }
   0x5   : > { %p200_p2 = scmp.lt.s32.totalorder %s903_s16, 17 }
   0x6   : > { %s1030_s17 = smov (%p23_p0, %s22_s17), 0  ;;  %s1032_s18 = smov (!%p23_p0, %s25_s18), %s899_s15 }
   0x7   : > { %p201_p3 = pnand %p711_p1, %p200_p2  ;;  %p27_p4 = scmp.ge.s32.totalorder %s1032_s18, 2 }
   0x8   : > { %s712_s19 = sshll.u32 (!%p201_p3), %s887_s12, 1  ;;  %p252_p5 = scmp.lt.s32.totalorder (!%p201_p3), %s891_s13, 1 }
   0x9   : > { %s1034_s18 = smov (%p27_p4, %s1032_s18), 0  ;;  %204 = sbr.rel (%p201_p3) target bundleno = 301 (0x12d), region = 32 }
   0xa   : > { %s249_s20 = ssub.s32 (!%p201_p3), 7, %s712_s19  ;;  %p718_p7 = scmp.ne.s32.totalorder (!%p201_p3), %s887_s12, 0 }
   0xb   : > { %s250_s21 = smul.u32 (!%p201_p3), %s891_s13, %s249_s20 }
   0xd   : > { %s251_s22 = sadd.s32 (!%p201_p3), %s887_s12, %s250_s21 }
   0xe   : > { %p254_p6 = scmp.lt.s32.totalorder (!%p201_p3), %s251_s22, 7 }
  0x10   : > { %s1036_s13 = smov (!%p252_p5, %s891_s13), 1  ;;  %s1038_s22 = smov (!%p254_p6, %s251_s22), 7 }
  0x11   : > { %s808_s23 = smul.u32 24, %s1036_s13  ;;  %s716_s25 = sshll.u32 %s1036_s13, 3  ;;  %vm294_vm0 = vcmask (!%p718_p7), 254976   ;;  %v905_v0 = vmov (!%p718_p7), 0.0  }
  0x12   : > { %s809_s24 = smul.u32 96, %s1036_s13  ;;  %s283_s4 = sadd.s32 %s716_s25, %s1038_s22  ;;  %295 = vst.msk [vmem:[#allocation2] sm:$0x3] (!%p718_p7), %vm294_vm0, %v905_v0 }
  0x13   : > { %s810_s29 = smul.u32 3, %s1036_s13  ;;  %s717_s8 = sshll.u32 %s283_s4, 1 }
  0x14   : > { %s966_s28 = scalar_lea.vmem %s1022_s1, %s809_s24  ;;  %s807_s30 = smul.u32 3, %s1038_s22 }
  0x15   : > { %s971_s7 = scalar_lea.vmem %s1023_s2, %s810_s29  ;;  %s976_s19 = scalar_lea.vmem %s1024_s3, %s717_s8 }
  0x16   : > { %s258_s9 = sadd.s32 %s808_s23, %s807_s30  ;;  %293 = sbr.rel (%p718_p7) target bundleno = 29 (0x1d), region = 36 }
  0x17   : > { %s713_s20 = sshll.u32 %s258_s9, 1 }
  0x18   : > { %s981_s24 = scalar_lea.vmem %s1021_s0, %s713_s20 }
  0x1d PF: > { %v297_v1 = vld [vmem:[%s966_s28] sm:$0xff]  ;;  %v298_v2 = vld [vmem:[%s966_s28 + $0x8] sm:$0xff]  ;;  %v299_v3 = vld [vmem:[%s966_s28 + $0x10] sm:$0xff]  ;;  %v906_v4 = vmov 0.0|0.0   ;;  %vm907_vm1 = vmmov 0   ;;  %v908_v7 = vmov 0.0  }
  0x1e   : > { %789 = vmatprep.subr.bf16.mxu0 %v906_v4  ;;  %v790_v5 = vpack.c.bf16 %v298_v2, %v297_v1  ;;  %v300_v6 = vld [vmem:[%s966_s28 + $0x18] sm:$0xff]  ;;  %764 = vmatprep.mubr.msk.f32.mxu0 %vm907_vm1, %v908_v7  ;;  %v721_v8 = vld [vmem:[%s966_s28 + $0x20] sm:$0xff]  ;;  %v722_v9 = vld [vmem:[%s966_s28 + $0x28] sm:$0xff]  ;;  %vm308_vm2 = vcmask 261120   ;;  %vm574_vm3 = vcmask 254976  }
  0x1f   : > { %795 = vmatprep.subr.bf16.mxu1 %v906_v4  ;;  %v723_v10 = vld [vmem:[%s966_s28 + $0x30] sm:$0xff]  ;;  %v724_v11 = vld [vmem:[%s966_s28 + $0x38] sm:$0xff]  ;;  %775 = vmatprep.mubr.msk.f32.mxu1 %vm907_vm1, %v908_v7  ;;  %v793_v12 = vpack.c.bf16 %v300_v6, %v299_v3  ;;  %v796_v13 = vpack.c.bf16 %v722_v9, %v721_v8  ;;  %v728_v14 = vld [vmem:[%s966_s28 + $0x40] sm:$0xff] }
  0x20   : > { %791 = vmatpush3.bf16.msra.mxu0 %v790_v5  ;;  %v729_v15 = vld [vmem:[%s966_s28 + $0x48] sm:$0xff]  ;;  %v799_v16 = vpack.c.bf16 %v724_v11, %v723_v10  ;;  %v296_v17 = vld [vmem:[#allocation2] sm:$0x3]  ;;  %v730_v19 = vld [vmem:[%s966_s28 + $0x50] sm:$0xff] }
  0x21   : > { %792 = vmatprep.subr.bf16.mxu0 %v906_v4  ;;  %797 = vmatpush3.bf16.msra.mxu1 %v796_v13  ;;  %v802_v18 = vpack.c.bf16 %v729_v15, %v728_v14  ;;  %v731_v20 = vld [vmem:[%s966_s28 + $0x58] sm:$0xff]  ;;  %v719_v22 = vld [vmem:[%s971_s7] ss:$0 sm:$0xff]  ;;  %v726_v25 = vld [vmem:[%s971_s7 + $0x1] ss:$0 sm:$0xff] }
  0x22   : > { %798 = vmatprep.subr.bf16.mxu1 %v906_v4  ;;  %v805_v21 = vpack.c.bf16 %v731_v20, %v730_v19  ;;  %v548_v24 = vld [vmem:[%s981_s24] sm:$0x3]  ;;  %v736_v29 = vld [vmem:[%s981_s24 + $0x2] sm:$0x3]  ;;  %v738_v45 = vld [vmem:[%s981_s24 + $0x4] sm:$0x3] }
  0x23   : > { %v733_v41 = vld [vmem:[%s971_s7 + $0x2] ss:$0 sm:$0xff] }
  0x24   : > { %794 = vmatpush3.bf16.msra.mxu0 %v793_v12 }
  0x25   : > { %801 = vmatprep.subr.bf16.mxu0 %v906_v4  ;;  %800 = vmatpush3.bf16.msra.mxu1 %v799_v16 }
  0x27   : > { %765 = vmatmul.mubr.msk.f32.vlgmr.msra.gmra.mrb[0].mxu0 %vm308_vm2, %v296_v17 }
  0x28   : > { %803 = vmatpush3.bf16.msra.mxu0 %v802_v18  ;;  %786 = vmatprep.mubr.msk.f32.mxu0 %vm907_vm1, %v908_v7 }
  0x29   : > { %776 = vmatmul.mubr.msk.f32.vlgmr.msra.gmra.mrb[0].mxu1 %vm308_vm2, %v296_v17  ;;  %804 = vmatprep.subr.bf16.mxu0 %v906_v4 }
  0x2c   : > { %806 = vmatpush3.bf16.msra.mxu0 %v805_v21 }
  0x2f   : > { %787 = vmatmul.mubr.msk.f32.vlgmr.msra.gmra.mrb[2].mxu0 %vm308_vm2, %v296_v17 }
  0xfa   : > { %v378_v23 = vpop.f32.mrb[0].mxu0 }
  0xfb   : > { %v379_v26 = vadd.f32 %v719_v22, %v378_v23  ;;  %v766_v27 = vpop.f32.mrb[1].mxu0 }
  0xfc   : > { %v461_v28 = vpop.f32.mrb[0].mxu1 }
  0xfd   : > { %v549_v30 = vadd.f32 %v548_v24, %v379_v26  ;;  %v462_v31 = vadd.f32 %v726_v25, %v461_v28  ;;  %v777_v32 = vpop.f32.mrb[1].mxu1 }
  0xff   : > { %v735_v33 = vmul.f32 -1.442695, %v549_v30  ;;  %v558_v34 = vadd.f32 %v736_v29, %v462_v31 }
 0x101   : > { %855 = vpow2.f32 %v735_v33  ;;  %v737_v35 = vmul.f32 -1.442695, %v558_v34 }
 0x102   : > { %v544_v36 = vpop.f32.mrb[2].mxu0 }
 0x103   : > { %v788_v37 = vpop.f32.mrb[3].mxu0  ;;  %857 = vpow2.f32 %v737_v35  ;;  %v545_v43 = vadd.f32 %v733_v41, %v544_v36 }
 0x10b   : > { %v856_v38 = vpop.eup %855 }
 0x10c   : > { %v553_v39 = vadd.f32 1.0, %v856_v38 }
 0x10d   : > { %v858_v40 = vpop.eup %857 }
 0x10e   : > { %859 = vrcp.f32 %v553_v39  ;;  %v562_v42 = vadd.f32 1.0, %v858_v40 }
 0x110   : > { %861 = vrcp.f32 %v562_v42 }
 0x118   : > { %v860_v44 = vpop.eup %859 }
 0x119   : > { %v567_v46 = vmul.f32 %v860_v44, %v545_v43 }
 0x11a   : > { %v862_v48 = vpop.eup %861 }
 0x11b   : > { %v568_v47 = vadd.f32 %v738_v45, %v567_v46  ;;  %v570_v49 = vsub.f32 1.0, %v862_v48  ;;  %v572_v51 = vmul.f32 %v862_v48, %v296_v17 }
 0x11d   : > { %863 = vtanh.f32 %v568_v47 }
 0x127   : > { %v864_v50 = vpop.eup %863 }
 0x128   : > { %v571_v52 = vmul.f32 %v864_v50, %v570_v49 }
 0x12a   : > { %v573_v53 = vadd.f32 %v572_v51, %v571_v52 }
 0x12c   : > { %575 = vst.msk [vmem:[#allocation2] sm:$0x3] %vm574_vm3, %v573_v53  ;;  %576 = vst.msk [vmem:[%s976_s19] sm:$0x3] %vm574_vm3, %v573_v53 }
 0x12d PF: > { %s13_s16 = sadd.s32 1, %s903_s16   ;;  %s1025_s12 = smov %s895_s14 }
 0x12e   : > { %p10_p8 = scmp.ge.s32.totalorder %s13_s16, 18   ;;  %s1026_s13 = smov %s899_s15 }
 0x12f   : > { %s1027_s14 = smov %s1030_s17  ;;  %s1028_s15 = smov %s1034_s18 }
 0x130   :  { %12 = sbr.rel (!%p10_p8) target bundleno = 3 (0x3), region = 78 }

// kernel: _lambda_.11
= control target key start
LH: loop header
LB: loop body
LE: loop exit
PB: predicated region body
PF: predicated region fallthrough
CT: control target
= control target key end

     0   :  { %vm27_vm0 = vcmask 261120   ;;  %s194_s1 = inlined_call_operand.vmem [shape: f32[32,32], index: 1, kind: input, shape index: {}]   ;;  %s195_s0 = inlined_call_operand.vmem [shape: f32[16,32], index: 0, kind: input, shape index: {}]   ;;  %s196_s2 = inlined_call_operand.vmem [shape: f32[1,32], index: 2, kind: input, shape index: {}]   ;;  %s197_s3 = inlined_call_operand.vmem [shape: f32[16,32], index: 3, kind: output, shape index: {}]  }
   0x1   :  { %v16_v0 = vld [vmem:[%s194_s1] sm:$0xff]  ;;  %v17_v1 = vld [vmem:[%s194_s1 + $0x8] sm:$0xff]  ;;  %v18_v2 = vld [vmem:[%s194_s1 + $0x10] sm:$0xff] }
   0x2   :  { %v135_v3 = vpack.c.bf16 %v17_v1, %v16_v0  ;;  %v19_v4 = vld [vmem:[%s194_s1 + $0x18] sm:$0xff]  ;;  %v14_v5 = vld [vmem:[%s195_s0] sm:$0xff]  ;;  %v15_v7 = vld [vmem:[%s195_s0 + $0x8] sm:$0xff] }
   0x3   :  { %v139_v6 = vpack.c.bf16 %v19_v4, %v18_v2  ;;  %132 = vmatprep.mubr.msk.f32.mxu0 %vm27_vm0, %v14_v5  ;;  %v115_v8 = vld [vmem:[%s196_s2] ss:$0 sm:$0xff] }
   0x4   :  { %136 = vmatprep.subr.bf16.mxu0 %v135_v3 }
   0x5   :  { %138 = vmatpush3.bf16.msra.mxu0 %v135_v3 }
   0x6   :  { %140 = vmatprep.subr.bf16.mxu0 %v139_v6 }
   0x9   :  { %142 = vmatpush3.bf16.msra.mxu0 %v139_v6 }
   0xc   :  { %133 = vmatmul.mubr.msk.f32.vlgmr.msra.gmra.mrb[0].mxu0 %vm27_vm0, %v15_v7 }
  0xdf   :  { %v134_v9 = vpop.f32.mrb[0].mxu0 }
  0xe0   :  { %v106_v10 = vadd.f32 %v134_v9, %v115_v8  ;;  %v100_v11 = vpop.f32.mrb[1].mxu0 }
  0xe1   :  { %v101_v12 = vadd.f32 %v115_v8, %v100_v11 }
  0xe2   :  { %110 = vst.msk [vmem:[%s197_s3 + $0x8] sm:$0xff] %vm27_vm0, %v106_v10 }
  0xe3   :  { %109 = vst.msk [vmem:[%s197_s3] sm:$0xff] %vm27_vm0, %v101_v12 }

// kernel: _lambda_.13
= control target key start
LH: loop header
LB: loop body
LE: loop exit
PB: predicated region body
PF: predicated region fallthrough
CT: control target
= control target key end

     0   :  { %v132_v0 = vmov 0.0|0.0   ;;  %vm133_vm0 = vmmov 0   ;;  %v134_v4 = vmov 0.0   ;;  %vm26_vm1 = vcmask 261120   ;;  %s176_s1 = inlined_call_operand.vmem [shape: f32[32,32], index: 1, kind: input, shape index: {}]   ;;  %s177_s0 = inlined_call_operand.vmem [shape: f32[8,32], index: 0, kind: input, shape index: {}]   ;;  %s178_s2 = inlined_call_operand.vmem [shape: f32[1,32], index: 2, kind: input, shape index: {}]   ;;  %s179_s3 = inlined_call_operand.vmem [shape: f32[8,32], index: 3, kind: output, shape index: {}]  }
   0x1   :  { %123 = vmatprep.subr.bf16.mxu0 %v132_v0  ;;  %v15_v1 = vld [vmem:[%s176_s1] sm:$0xff]  ;;  %v16_v2 = vld [vmem:[%s176_s1 + $0x8] sm:$0xff]  ;;  %v17_v3 = vld [vmem:[%s176_s1 + $0x10] sm:$0xff]  ;;  %120 = vmatprep.mubr.msk.f32.mxu0 %vm133_vm0, %v134_v4 }
   0x2   :  { %v124_v5 = vpack.c.bf16 %v16_v2, %v15_v1  ;;  %v18_v6 = vld [vmem:[%s176_s1 + $0x18] sm:$0xff]  ;;  %v14_v8 = vld [vmem:[%s177_s0] sm:$0xff] }
   0x3   :  { %v127_v7 = vpack.c.bf16 %v18_v6, %v17_v3  ;;  %v105_v9 = vld [vmem:[%s178_s2] ss:$0 sm:$0xff] }
   0x4   :  { %125 = vmatpush3.bf16.msra.mxu0 %v124_v5 }
   0x5   :  { %126 = vmatprep.subr.bf16.mxu0 %v132_v0 }
   0x8   :  { %128 = vmatpush3.bf16.msra.mxu0 %v127_v7 }
   0xb   :  { %121 = vmatmul.mubr.msk.f32.vlgmr.msra.gmra.mrb[0].mxu0 %vm26_vm1, %v14_v8 }
  0xde   :  { %v96_v10 = vpop.f32.mrb[0].mxu0 }
  0xdf   :  { %v97_v11 = vadd.f32 %v105_v9, %v96_v10  ;;  %v122_v12 = vpop.f32.mrb[1].mxu0 }
  0xe1   :  { %100 = vst.msk [vmem:[%s179_s3] sm:$0xff] %vm26_vm1, %v97_v11 }

// kernel: _lambda_.12
= control target key start
LH: loop header
LB: loop body
LE: loop exit
PB: predicated region body
PF: predicated region fallthrough
CT: control target
= control target key end

     0   :  { %s2623_s21 = smov 0   ;;  %s2972_s0 = inlined_call_operand.vmem [shape: f32[4,2,16], index: 0, kind: input, shape index: {}]   ;;  %s2973_s1 = inlined_call_operand.vmem [shape: f32[2,8,32], index: 1, kind: input, shape index: {}]   ;;  %s2974_s2 = inlined_call_operand.vmem [shape: f32[2,8,32], index: 2, kind: input, shape index: {}]   ;;  %s2975_s3 = inlined_call_operand.vmem [shape: f32[32,32], index: 3, kind: input, shape index: {}]   ;;  %s2976_s4 = inlined_call_operand.vmem [shape: f32[1,32], index: 4, kind: input, shape index: {}]   ;;  %s2977_s5 = inlined_call_operand.vmem [shape: f32[1,32], index: 5, kind: input, shape index: {}]   ;;  %s2978_s6 = inlined_call_operand.vmem [shape: f32[2,2,32], index: 6, kind: input, shape index: {}]   ;;  %s2979_s7 = inlined_call_operand.vmem [shape: f32[3,16,32], index: 7, kind: input, shape index: {}]   ;;  %s2980_s8 = inlined_call_operand.vmem [shape: f32[3,32,32], index: 8, kind: input, shape index: {}]   ;;  %s2981_s9 = inlined_call_operand.vmem [shape: f32[3,32,32], index: 9, kind: input, shape index: {}]   ;;  %s2982_s10 = inlined_call_operand.vmem [shape: f32[3,1,32], index: 10, kind: input, shape index: {}]   ;;  %s2983_s11 = inlined_call_operand.vmem [shape: f32[3,1,32], index: 11, kind: input, shape index: {}]   ;;  %s2984_s12 = inlined_call_operand.vmem [shape: f32[3,32,32], index: 12, kind: input, shape index: {}]   ;;  %s2985_s13 = inlined_call_operand.vmem [shape: f32[3,32,32], index: 13, kind: input, shape index: {}]   ;;  %s2986_s14 = inlined_call_operand.vmem [shape: f32[3,1,32], index: 14, kind: input, shape index: {}]   ;;  %s2987_s15 = inlined_call_operand.vmem [shape: f32[3,1,32], index: 15, kind: input, shape index: {}]   ;;  %s2988_s16 = inlined_call_operand.vmem [shape: f32[4,2,32], index: 16, kind: output, shape index: {}]  }
   0x1   :  { %2989 = sst [smem:[#allocation3_spill]] %s2972_s0 }
   0x2 LB: > { %s2053_s22 = sadd.s32 4294967295, %s2532_s21   ;;  %p2057_p0 = scmp.ge.s32.totalorder %s2532_s21, 1  ;;  %s2532_s21 = sphi %s2623_s21, %s26_s21  }
   0x3   : > { %p461_p1 = scmp.lt.s32.totalorder %s2532_s21, 5 }
   0x5   : > { %p462_p2 = pnand %p2057_p0, %p461_p1 }
   0x6   : > { %p509_p3 = scmp.lt.s32.totalorder (!%p462_p2), %s2053_s22, 3  ;;  %s2990_s27 = sld [smem:[#allocation3_spill]] (!%p462_p2) }
   0x7   : > { %465 = sbr.rel (%p462_p2) target bundleno = 1032 (0x408), region = 84  ;;  %p2060_p4 = scmp.ne.s32.totalorder (!%p462_p2), %s2053_s22, 0 }
   0xe   : > { %s510_s23 = scalar_select %p509_p3, %s2053_s22, 3 }
   0xf   : > { %520 = sbr.rel (%p2060_p4) target bundleno = 22 (0x16), region = 88  ;;  %v521_v0 = vld [vmem:[%s2978_s6] sm:$0x3] (!%p2060_p4)  ;;  %vm523_vm0 = vcmask (!%p2060_p4), 254976   ;;  %v522_v1 = vld [vmem:[%s2978_s6 + $0x2] sm:$0x3] (!%p2060_p4) }
  0x10   : > { %s2058_s24 = sshll.u32 %s510_s23, 1  ;;  %524 = vst.msk [vmem:[#allocation2] sm:$0x3] (!%p2060_p4), %vm523_vm0, %v521_v0  ;;  %525 = vst.msk [vmem:[#allocation2 + $0x2] sm:$0x3] (!%p2060_p4), %vm523_vm0, %v522_v1 }
  0x11   : > { %s2634_s28 = scalar_lea.vmem %s2990_s27, %s2058_s24  ;;  %s2639_s0 = scalar_lea.vmem %s2988_s16, %s2058_s24 }
  0x16 PF: > { %v532_v2 = vld [vmem:[%s2975_s3] sm:$0xff]  ;;  %v533_v3 = vld [vmem:[%s2975_s3 + $0x8] sm:$0xff]  ;;  %v534_v4 = vld [vmem:[%s2975_s3 + $0x10] sm:$0xff]  ;;  %v2534_v5 = vmov 0.0|0.0   ;;  %vm2535_vm1 = vmmov 0   ;;  %v2536_v8 = vmov 0.0   ;;  %v623_v17 = vlaneseq }
  0x17   : > { %2379 = vmatprep.subr.bf16.mxu0 %v2534_v5  ;;  %v2380_v6 = vpack.c.bf16 %v533_v3, %v532_v2  ;;  %v535_v7 = vld [vmem:[%s2975_s3 + $0x18] sm:$0xff]  ;;  %2223 = vmatprep.mubr.msk.f32.mxu0 %vm2535_vm1, %v2536_v8  ;;  %v526_v9 = vld [vmem:[#allocation2] sm:$0x3]  ;;  %v527_v10 = vld [vmem:[#allocation2 + $0x2] sm:$0x3]  ;;  %vm528_vm2 = vcmask 254976  }
  0x18   : > { %2385 = vmatprep.subr.bf16.mxu1 %v2534_v5  ;;  %2234 = vmatprep.mubr.msk.f32.mxu1 %vm2535_vm1, %v2536_v8  ;;  %v2383_v11 = vpack.c.bf16 %v535_v7, %v534_v4  ;;  %v529_v12 = vsel %vm528_vm2, %v526_v9, 0.0  ;;  %v530_v13 = vsel %vm528_vm2, %v527_v10, 0.0  ;;  %vm543_vm3 = vcmask 261120   ;;  %v2061_v20 = vld [vmem:[%s2976_s4] ss:$0 sm:$0xff]  ;;  %v618_v32 = vld [vmem:[%s2973_s1 + $0x8] sm:$0xff] }
  0x19   : > { %2381 = vmatpush3.bf16.msra.mxu0 %v2380_v6  ;;  %v531_v14 = vadd.f32 %v530_v13, %v529_v12  ;;  %v2537_v15 = vmov 1966171168   ;;  %v624_v19 = vshrl.u32 %v623_v17, 7  ;;  %v617_v29 = vld [vmem:[%s2973_s1] sm:$0xff]  ;;  %v727_v44 = vld [vmem:[%s2980_s8 + $0x8] sm:$0xff]  ;;  %v728_v48 = vld [vmem:[%s2980_s8 + $0x10] sm:$0xff] }
  0x1a   : > { %2382 = vmatprep.subr.bf16.mxu0 %v2534_v5  ;;  %v621_v16 = vunpack.c.l.s4 %v2537_v15  ;;  %v2063_v35 = vld [vmem:[%s2977_s5] ss:$0 sm:$0xff]  ;;  %v2070_v47 = vld [vmem:[%s2980_s8 + $0x28] sm:$0xff]  ;;  %v729_v49 = vld [vmem:[%s2980_s8 + $0x18] sm:$0xff]  ;;  %vm732_vm4 = vcmask 1041409   ;;  %vm806_vm5 = vcmask 130048  }
  0x1b   : > { %v644_v26 = vsub.s32 0, %v624_v19  ;;  %v726_v43 = vld [vmem:[%s2980_s8] sm:$0xff]  ;;  %v2071_v51 = vld [vmem:[%s2980_s8 + $0x30] sm:$0xff]  ;;  %v2072_v52 = vld [vmem:[%s2980_s8 + $0x38] sm:$0xff]  ;;  %v2389_v53 = vpack.c.bf16 %v729_v49, %v728_v48 }
  0x1c   : > { %v622_v18 = vunpack.c.0.s8 %v621_v16  ;;  %v2069_v45 = vld [vmem:[%s2980_s8 + $0x20] sm:$0xff]  ;;  %v2386_v46 = vpack.c.bf16 %v727_v44, %v726_v43  ;;  %v2398_v54 = vpack.c.bf16 %v2072_v52, %v2071_v51 }
  0x1d   : > { %2384 = vmatpush3.bf16.msra.mxu0 %v2383_v11  ;;  %v2395_v50 = vpack.c.bf16 %v2070_v47, %v2069_v45  ;;  %v724_v44 = vld [vmem:[%s2979_s7] sm:$0xff]  ;;  %v725_v45 = vld [vmem:[%s2979_s7 + $0x8] sm:$0xff]  ;;  %v2068_v47 = vld [vmem:[%s2979_s7 + $0x18] sm:$0xff] }
  0x1e   : > { %2394 = vmatprep.subr.bf16.mxu0 %v2534_v5  ;;  %v625_v21 = vsub.s32 %v622_v18, %v624_v19  ;;  %2387 = vmatpush3.bf16.msra.mxu1 %v2386_v46  ;;  %v2067_v46 = vld [vmem:[%s2979_s7 + $0x10] sm:$0xff]  ;;  %v2392_v51 = vpack.c.bf16 %v725_v45, %v724_v44 }
  0x1f   : > { %2388 = vmatprep.subr.bf16.mxu1 %v2534_v5  ;;  %v2401_v52 = vpack.c.bf16 %v2068_v47, %v2067_v46 }
  0x20   : > { %2224 = vmatmul.mubr.msk.f32.vlgmr.msra.gmra.mrb[0].mxu0 %vm543_vm3, %v531_v14 }
  0x21   : > { %2252 = vmatprep.mubr.msk.f32.mxu0 %vm2535_vm1, %v2536_v8  ;;  %2396 = vmatpush3.bf16.msra.mxu0 %v2395_v50 }
  0x22   : > { %2397 = vmatprep.subr.bf16.mxu0 %v2534_v5  ;;  %2390 = vmatpush3.bf16.msra.mxu1 %v2389_v53 }
  0x23   : > { %2391 = vmatprep.subr.bf16.mxu1 %v2534_v5 }
  0x25   : > { %2399 = vmatpush3.bf16.msra.mxu0 %v2398_v54  ;;  %v2079_v54 = vld [vmem:[%s2980_s8 + $0x40] sm:$0xff] }
  0x26   : > { %2400 = vmatprep.subr.bf16.mxu0 %v2534_v5 }
  0xf3   : > { %v613_v22 = vpop.f32.mrb[0].mxu0 }
  0xf4   : > { %v614_v23 = vadd.f32 %v2061_v20, %v613_v22  ;;  %v2225_v24 = vpop.f32.mrb[1].mxu0 }
  0xf6   : > { %v626_v25 = vrot.slane %v614_v23, %v625_v21 }
  0xf8   : > { %v627_v27 = vcombine.high %v626_v25, %v626_v25  ;;  %v634_v28 = vrot.slane %v626_v25, %v625_v21 }
  0xfa   : > { %v641_v30 = vrot.slane %v627_v27, %v625_v21  ;;  %v645_v31 = vrot.slane %v634_v28, %v644_v26 }
  0xfc   : > { %v652_v33 = vadd.f32 %v645_v31, %v617_v29  ;;  %v649_v34 = vrot.slane %v641_v30, %v644_v26  ;;  %v705_v26 = vld [vmem:[%s2974_s2] sm:$0xff]  ;;  %v706_v30 = vld [vmem:[%s2974_s2 + $0x8] sm:$0xff] }
  0xfe   : > { %v654_v36 = vmax.f32 %v652_v33, 0.0  ;;  %v653_v37 = vadd.f32 %v649_v34, %v618_v32 }
 0x100   : > { %v663_v38 = vmul.f32 %v2063_v35, %v654_v36  ;;  %v655_v39 = vmax.f32 %v653_v37, 0.0 }
 0x102   : > { %v665_v40 = vsel %vm543_vm3, %v663_v38, 0.0  ;;  %v664_v41 = vmul.f32 %v2063_v35, %v655_v39 }
 0x103   : > { %666 = vadd.xlane.f32.xlu0 %v665_v40 }
 0x104   : > { %v668_v42 = vsel %vm543_vm3, %v664_v41, 0.0 }
 0x107   : > { %669 = vadd.xlane.f32.xlu0 %v668_v42 }
 0x190   : > { %v667_v55 = vpop.xlane.xlu0 %666 }
 0x191   : > { %v671_v56 = vrot.slane %v667_v55, 4 }
 0x193   : > { %v672_v57 = vmax.f32 %v667_v55, %v671_v56  ;;  %v2077_v56 = vld [vmem:[%s2979_s7 + $0x20] sm:$0xff] }
 0x194   : > { %v670_v58 = vpop.xlane.xlu0 %669 }
 0x195   : > { %v673_v59 = vrot.slane %v672_v57, 2  ;;  %v677_v60 = vrot.slane %v670_v58, 4 }
 0x197   : > { %v674_v61 = vmax.f32 %v672_v57, %v673_v59  ;;  %v678_v62 = vmax.f32 %v670_v58, %v677_v60  ;;  %v2078_v57 = vld [vmem:[%s2979_s7 + $0x28] sm:$0xff] }
 0x198   : > { %v2410_v60 = vpack.c.bf16 %v2078_v57, %v2077_v56  ;;  %v2101_v57 = vld [vmem:[%s2983_s11 + $0x2] ss:$0 sm:$0xff] }
 0x199   : > { %v675_v63 = vrot.slane %v674_v61, 1  ;;  %v679_v0 = vrot.slane %v678_v62, 2 }
 0x19b   : > { %v676_v1 = vmax.f32 %v674_v61, %v675_v63  ;;  %v680_v2 = vmax.f32 %v678_v62, %v679_v0  ;;  %v2081_v61 = vld [vmem:[%s2980_s8 + $0x50] sm:$0xff]  ;;  %v2082_v62 = vld [vmem:[%s2980_s8 + $0x58] sm:$0xff]  ;;  %v2089_v63 = vld [vmem:[%s2981_s9 + $0x20] sm:$0xff] }
 0x19c   : > { %v2090_v0 = vld [vmem:[%s2981_s9 + $0x28] sm:$0xff] }
 0x19d   : > { %v683_v3 = vsub.f32 %v667_v55, %v676_v1  ;;  %v681_v4 = vrot.slane %v680_v2, 1  ;;  %v2080_v55 = vld [vmem:[%s2980_s8 + $0x48] sm:$0xff]  ;;  %v2407_v1 = vpack.c.bf16 %v2082_v62, %v2081_v61 }
 0x19e   : > { %v2404_v59 = vpack.c.bf16 %v2080_v55, %v2079_v54 }
 0x19f   : > { %v685_v6 = vmul.f32 1.442695, %v683_v3  ;;  %v682_v7 = vmax.f32 %v680_v2, %v681_v4  ;;  %v2419_v2 = vpack.c.bf16 %v2090_v0, %v2089_v63  ;;  %v1203_v3 = vld [vmem:[%s2981_s9] sm:$0xff]  ;;  %v1204_v4 = vld [vmem:[%s2981_s9 + $0x8] sm:$0xff] }
 0x1a1   : > { %2498 = vpow2.f32 %v685_v6  ;;  %v684_v9 = vsub.f32 %v670_v58, %v682_v7  ;;  %v723_v58 = vld [vmem:[%s2634_s28] sm:$0x3]  ;;  %v2091_v6 = vld [vmem:[%s2981_s9 + $0x30] sm:$0xff]  ;;  %v2092_v7 = vld [vmem:[%s2981_s9 + $0x38] sm:$0xff] }
 0x1a3   : > { %v687_v10 = vmul.f32 1.442695, %v684_v9  ;;  %v2413_v9 = vpack.c.bf16 %v1204_v4, %v1203_v3  ;;  %v2115_v4 = vld [vmem:[%s2984_s12 + $0x48] sm:$0xff] }
 0x1a5   : > { %2500 = vpow2.f32 %v687_v10  ;;  %v2422_v10 = vpack.c.bf16 %v2092_v7, %v2091_v6  ;;  %v2123_v6 = vld [vmem:[%s2985_s13 + $0x20] sm:$0xff]  ;;  %v2124_v7 = vld [vmem:[%s2985_s13 + $0x28] sm:$0xff] }
 0x1ab   : > { %v2499_v11 = vpop.eup %2498 }
 0x1ac   : > { %v689_v12 = vrot.slane %v2499_v11, 4 }
 0x1ae   : > { %v690_v13 = vadd.f32 %v2499_v11, %v689_v12  ;;  %v1206_v12 = vld [vmem:[%s2981_s9 + $0x18] sm:$0xff] }
 0x1af   : > { %v2501_v14 = vpop.eup %2500 }
 0x1b0   : > { %v691_v15 = vrot.slane %v690_v13, 2  ;;  %v695_v16 = vrot.slane %v2501_v14, 4 }
 0x1b2   : > { %v696_v17 = vadd.f32 %v2501_v14, %v695_v16  ;;  %v692_v18 = vadd.f32 %v691_v15, %v690_v13  ;;  %v2799_v13 = vld [vmem:[#allocation2] sm:$0x3]  ;;  %v2097_v16 = vld [vmem:[%s2981_s9 + $0x48] sm:$0xff] }
 0x1b3   : > { %v2096_v15 = vld [vmem:[%s2981_s9 + $0x40] sm:$0xff] }
 0x1b4   : > { %v697_v19 = vrot.slane %v696_v17, 2  ;;  %v693_v20 = vrot.slane %v692_v18, 1 }
 0x1b6   : > { %v698_v21 = vadd.f32 %v697_v19, %v696_v17  ;;  %v694_v22 = vadd.f32 %v693_v20, %v692_v18  ;;  %v2425_v17 = vpack.c.bf16 %v2097_v16, %v2096_v15  ;;  %v2098_v18 = vld [vmem:[%s2981_s9 + $0x50] sm:$0xff]  ;;  %v2099_v19 = vld [vmem:[%s2981_s9 + $0x58] sm:$0xff] }
 0x1b7   : > { %v2428_v20 = vpack.c.bf16 %v2099_v19, %v2098_v18  ;;  %v2116_v15 = vld [vmem:[%s2984_s12 + $0x50] sm:$0xff]  ;;  %v2126_v19 = vld [vmem:[%s2985_s13 + $0x38] sm:$0xff] }
 0x1b8   : > { %v699_v23 = vrot.slane %v698_v21, 1  ;;  %2502 = vrcp.f32 %v694_v22  ;;  %v1476_v22 = vld [vmem:[%s2984_s12 + $0x8] sm:$0xff]  ;;  %v2125_v18 = vld [vmem:[%s2985_s13 + $0x30] sm:$0xff] }
 0x1ba   : > { %v700_v24 = vadd.f32 %v699_v23, %v698_v21  ;;  %v1475_v21 = vld [vmem:[%s2984_s12] sm:$0xff] }
 0x1bb   : > { %v2107_v23 = vld [vmem:[%s2984_s12 + $0x20] sm:$0xff] }
 0x1bc   : > { %2504 = vrcp.f32 %v700_v24  ;;  %v2431_v24 = vpack.c.bf16 %v1476_v22, %v1475_v21  ;;  %v1727_v21 = vld [vmem:[%s2985_s13] sm:$0xff]  ;;  %v1728_v22 = vld [vmem:[%s2985_s13 + $0x8] sm:$0xff] }
 0x1c2   : > { %v2503_v25 = vpop.eup %2502 }
 0x1c3   : > { %v702_v27 = vmul.f32 %v2503_v25, %v2499_v11  ;;  %v1205_v11 = vld [vmem:[%s2981_s9 + $0x10] sm:$0xff]  ;;  %v2108_v25 = vld [vmem:[%s2984_s12 + $0x28] sm:$0xff] }
 0x1c5   : > { %v707_v28 = vmul.f32 %v705_v26, %v702_v27  ;;  %v1477_v26 = vld [vmem:[%s2984_s12 + $0x10] sm:$0xff]  ;;  %v1478_v27 = vld [vmem:[%s2984_s12 + $0x18] sm:$0xff] }
 0x1c6   : > { %v2505_v29 = vpop.eup %2504 }
 0x1c7   : > { %v704_v31 = vmul.f32 %v2505_v29, %v2501_v14  ;;  %v709_v32 = vsel %vm543_vm3, %v707_v28, 0.0  ;;  %v2416_v14 = vpack.c.bf16 %v1206_v12, %v1205_v11  ;;  %v2437_v28 = vpack.c.bf16 %v2108_v25, %v2107_v23  ;;  %v2109_v29 = vld [vmem:[%s2984_s12 + $0x30] sm:$0xff]  ;;  %v2130_v23 = vld [vmem:[%s2985_s13 + $0x40] sm:$0xff] }
 0x1c8   : > { %v710_v33 = vrot.slane %v709_v32, 4  ;;  %v2449_v25 = vpack.c.bf16 %v1728_v22, %v1727_v21 }
 0x1c9   : > { %v708_v34 = vmul.f32 %v706_v30, %v704_v31  ;;  %v2110_v30 = vld [vmem:[%s2984_s12 + $0x38] sm:$0xff]  ;;  %v2434_v31 = vpack.c.bf16 %v1478_v27, %v1477_v26  ;;  %v1726_v26 = vld [vmem:[#allocation2 + $0x2] sm:$0x3]  ;;  %v1729_v27 = vld [vmem:[%s2985_s13 + $0x10] sm:$0xff] }
 0x1ca   : > { %v711_v35 = vadd.f32 %v710_v33, %v709_v32  ;;  %v2440_v32 = vpack.c.bf16 %v2110_v30, %v2109_v29  ;;  %v2132_v30 = vld [vmem:[%s2985_s13 + $0x50] sm:$0xff] }
 0x1cb   : > { %v716_v36 = vsel %vm543_vm3, %v708_v34, 0.0 }
 0x1cc   : > { %v712_v37 = vrot.slane %v711_v35, 2  ;;  %v717_v38 = vrot.slane %v716_v36, 4 }
 0x1ce   : > { %v713_v39 = vadd.f32 %v712_v37, %v711_v35  ;;  %v718_v40 = vadd.f32 %v717_v38, %v716_v36  ;;  %v2066_v38 = vld [vmem:[%s2982_s10] ss:$0 sm:$0xff] }
 0x1d0   : > { %v719_v41 = vrot.slane %v718_v40, 2  ;;  %v714_v42 = vrot.slane %v713_v39, 1 }
 0x1d2   : > { %v720_v43 = vadd.f32 %v719_v41, %v718_v40  ;;  %v715_v49 = vadd.f32 %v714_v42, %v713_v39  ;;  %v2087_v39 = vld [vmem:[%s2983_s11] ss:$0 sm:$0xff]  ;;  %v2076_v41 = vld [vmem:[%s2982_s10 + $0x1] ss:$0 sm:$0xff] }
 0x1d3   : > { %v2094_v42 = vld [vmem:[%s2983_s11 + $0x1] ss:$0 sm:$0xff]  ;;  %v2466_v44 = vadd.f32 %v2087_v39, %v2066_v38  ;;  %v2105_v38 = vld [vmem:[%s2986_s14] ss:$0 sm:$0xff] }
 0x1d4   : > { %v721_v48 = vrot.slane %v720_v43, 1  ;;  %v2468_v45 = vadd.f32 %v2094_v42, %v2076_v41  ;;  %v2128_v39 = vld [vmem:[%s2987_s15 + $0x1] ss:$0 sm:$0xff] }
 0x1d6   : > { %v722_v50 = vadd.f32 %v721_v48, %v720_v43 }
 0x1d8   : > { %v733_v53 = vsel %vm732_vm4, %v722_v50, %v715_v49 }
 0x1d9   : > { %2235 = vmatmul.mubr.msk.f32.vlgmr.msra.gmra.mrb[0].mxu1 %vm543_vm3, %v733_v53  ;;  %2253 = vmatmul.mubr.msk.f32.vlgmr.msra.gmra.mrb[2].mxu0 %vm543_vm3, %v733_v53 }
 0x1da   : > { %2393 = vmatpush3.bf16.msra.mxu1 %v2392_v51  ;;  %2402 = vmatpush3.bf16.msra.mxu0 %v2401_v52 }
 0x1db   : > { %2241 = vmatprep.mubr.msk.f32.mxu1 %vm2535_vm1, %v2536_v8  ;;  %2259 = vmatprep.mubr.msk.f32.mxu0 %vm2535_vm1, %v2536_v8 }
 0x1dc   : > { %2403 = vmatprep.subr.bf16.mxu1 %v2534_v5  ;;  %2409 = vmatprep.subr.bf16.mxu0 %v2534_v5 }
 0x1e1   : > { %2242 = vmatmul.mubr.msk.f32.vlgmr.msra.gmra.mrb[0].mxu1 %vm806_vm5, %v723_v58  ;;  %2260 = vmatmul.mubr.msk.f32.vlgmr.msra.gmra.mrb[2].mxu0 %vm806_vm5, %v723_v58 }
 0x1e2   : > { %2405 = vmatpush3.bf16.msra.mxu1 %v2404_v59  ;;  %2411 = vmatpush3.bf16.msra.mxu0 %v2410_v60  ;;  %v2086_v60 = vld [vmem:[%s2982_s10 + $0x2] ss:$0 sm:$0xff] }
 0x1e3   : > { %2406 = vmatprep.subr.bf16.mxu1 %v2534_v5  ;;  %2277 = vmatprep.mubr.msk.f32.mxu0 %vm2535_vm1, %v2536_v8 }
 0x1e4   : > { %2418 = vmatprep.subr.bf16.mxu0 %v2534_v5  ;;  %2270 = vmatprep.mubr.msk.f32.mxu1 %vm2535_vm1, %v2536_v8 }
 0x1e5   : > { %2278 = vmatmul.mubr.msk.f32.vlgmr.msra.gmra.mrb[4].mxu0 %vm806_vm5, %v723_v58 }
 0x1e6   : > { %2408 = vmatpush3.bf16.msra.mxu1 %v2407_v1  ;;  %2420 = vmatpush3.bf16.msra.mxu0 %v2419_v2  ;;  %v2114_v2 = vld [vmem:[%s2984_s12 + $0x40] sm:$0xff] }
 0x1e7   : > { %2412 = vmatprep.subr.bf16.mxu1 %v2534_v5  ;;  %2421 = vmatprep.subr.bf16.mxu0 %v2534_v5  ;;  %v2443_v12 = vpack.c.bf16 %v2115_v4, %v2114_v2 }
 0x1e8   : > { %2299 = vmatprep.mubr.msk.f32.mxu0 %vm2535_vm1, %v2536_v8 }
 0x1e9   : > { %2271 = vmatmul.mubr.msk.f32.vlgmr.msra.gmra.mrb[2].mxu1 %vm543_vm3, %v733_v53 }
 0x1ea   : > { %2414 = vmatpush3.bf16.msra.mxu1 %v2413_v9  ;;  %2423 = vmatpush3.bf16.msra.mxu0 %v2422_v10 }
 0x1eb   : > { %2415 = vmatprep.subr.bf16.mxu1 %v2534_v5  ;;  %2288 = vmatprep.mubr.msk.f32.mxu1 %vm2535_vm1, %v2536_v8 }
 0x1ec   : > { %2430 = vmatprep.subr.bf16.mxu0 %v2534_v5 }
 0x1ed   : > { %2300 = vmatmul.mubr.msk.f32.vlgmr.msra.gmra.mrb[2].mxu0 %vm543_vm3, %v2799_v13 }
 0x1ee   : > { %2417 = vmatpush3.bf16.msra.mxu1 %v2416_v14  ;;  %2321 = vmatprep.mubr.msk.f32.mxu0 %vm2535_vm1, %v2536_v8  ;;  %v2455_v14 = vpack.c.bf16 %v2124_v7, %v2123_v6 }
 0x1ef   : > { %2424 = vmatprep.subr.bf16.mxu1 %v2534_v5  ;;  %2432 = vmatpush3.bf16.msra.mxu0 %v2431_v24  ;;  %v2131_v24 = vld [vmem:[%s2985_s13 + $0x48] sm:$0xff] }
 0x1f0   : > { %2433 = vmatprep.subr.bf16.mxu0 %v2534_v5  ;;  %v2461_v29 = vpack.c.bf16 %v2131_v24, %v2130_v23 }
 0x1f1   : > { %2289 = vmatmul.mubr.msk.f32.vlgmr.msra.gmra.mrb[0].mxu1 %vm543_vm3, %v2799_v13 }
 0x1f2   : > { %2426 = vmatpush3.bf16.msra.mxu1 %v2425_v17  ;;  %2310 = vmatprep.mubr.msk.f32.mxu1 %vm2535_vm1, %v2536_v8  ;;  %v2117_v17 = vld [vmem:[%s2984_s12 + $0x58] sm:$0xff] }
 0x1f3   : > { %2427 = vmatprep.subr.bf16.mxu1 %v2534_v5  ;;  %2435 = vmatpush3.bf16.msra.mxu0 %v2434_v31  ;;  %v2133_v31 = vld [vmem:[%s2985_s13 + $0x58] sm:$0xff] }
 0x1f4   : > { %2442 = vmatprep.subr.bf16.mxu0 %v2534_v5 }
 0x1f6   : > { %2429 = vmatpush3.bf16.msra.mxu1 %v2428_v20  ;;  %v2458_v20 = vpack.c.bf16 %v2126_v19, %v2125_v18 }
 0x1f7   : > { %2436 = vmatprep.subr.bf16.mxu1 %v2534_v5 }
 0x1f9   : > { %2311 = vmatmul.mubr.msk.f32.vlgmr.msra.gmra.mrb[4].mxu1 %vm543_vm3, %v2799_v13 }
 0x1fa   : > { %2332 = vmatprep.mubr.msk.f32.mxu1 %vm2535_vm1, %v2536_v8  ;;  %2438 = vmatpush3.bf16.msra.mxu1 %v2437_v28  ;;  %v1730_v28 = vld [vmem:[%s2985_s13 + $0x18] sm:$0xff] }
 0x1fb   : > { %2439 = vmatprep.subr.bf16.mxu1 %v2534_v5 }
 0x1fe   : > { %2441 = vmatpush3.bf16.msra.mxu1 %v2440_v32  ;;  %v2452_v32 = vpack.c.bf16 %v1730_v28, %v1729_v27 }
 0x1ff   : > { %2454 = vmatprep.subr.bf16.mxu1 %v2534_v5 }
 0x2b8   : > { %v1189_v33 = vpop.f32.mrb[4].mxu0 }
 0x2b9   : > { %v2279_v34 = vpop.f32.mrb[5].mxu0 }
 0x2bc   : > { %v1119_v35 = vpop.f32.mrb[2].mxu1 }
 0x2bd   : > { %v1190_v36 = vadd.f32 %v1189_v33, %v1119_v35  ;;  %v2272_v37 = vpop.f32.mrb[3].mxu1  ;;  %v2464_v33 = vpack.c.bf16 %v2133_v31, %v2132_v30 }
 0x2bf   : > { %v1201_v62 = vadd.f32 %v2086_v60, %v1190_v36 }
 0x2c0   : > { %v1366_v40 = vpop.f32.mrb[2].mxu0 }
 0x2c1   : > { %v2301_v43 = vpop.f32.mrb[3].mxu0  ;;  %v2469_v50 = vadd.f32 %v2468_v45, %v1366_v40 }
 0x2c3   : > { %v2104_v51 = vmul.f32 -1.442695, %v2469_v50 }
 0x2c4   : > { %v1283_v46 = vpop.f32.mrb[0].mxu1 }
 0x2c5   : > { %v2467_v47 = vadd.f32 %v2466_v44, %v1283_v46  ;;  %v2290_v48 = vpop.f32.mrb[1].mxu1 }
 0x2c7   : > { %v2103_v49 = vmul.f32 -1.442695, %v2467_v47 }
 0x2c9   : > { %2506 = vpow2.f32 %v2103_v49 }
 0x2ca   : > { %2508 = vpow2.f32 %v2104_v51 }
 0x2cc   : > { %v1449_v52 = vpop.f32.mrb[4].mxu1 }
 0x2cd   : > { %v2312_v53 = vpop.f32.mrb[5].mxu1  ;;  %v1450_v59 = vadd.f32 %v2101_v57, %v1449_v52 }
 0x2ce   : > { %v2135_v53 = vld [vmem:[%s2987_s15 + $0x2] ss:$0 sm:$0xff] }
 0x2d3   : > { %v2507_v54 = vpop.eup %2506 }
 0x2d4   : > { %v1457_v55 = vadd.f32 1.0, %v2507_v54  ;;  %v2509_v56 = vpop.eup %2508 }
 0x2d5   : > { %v1464_v58 = vadd.f32 1.0, %v2509_v56  ;;  %v2119_v56 = vld [vmem:[%s2986_s14 + $0x2] ss:$0 sm:$0xff] }
 0x2d6   : > { %2510 = vrcp.f32 %v1457_v55 }
 0x2d7   : > { %2512 = vrcp.f32 %v1464_v58 }
 0x2e0   : > { %v2511_v61 = vpop.eup %2510 }
 0x2e1   : > { %v1467_v63 = vmul.f32 %v2511_v61, %v1450_v59  ;;  %v2513_v1 = vpop.eup %2512 }
 0x2e2   : > { %v1470_v3 = vsub.f32 1.0, %v2513_v1  ;;  %v1472_v11 = vmul.f32 %v2513_v1, %v2799_v13  ;;  %v2446_v13 = vpack.c.bf16 %v2117_v17, %v2116_v15 }
 0x2e3   : > { %v1468_v0 = vadd.f32 %v1467_v63, %v1201_v62 }
 0x2e5   : > { %2514 = vtanh.f32 %v1468_v0 }
 0x2ef   : > { %v2515_v9 = vpop.eup %2514 }
 0x2f0   : > { %v1471_v10 = vmul.f32 %v2515_v9, %v1470_v3 }
 0x2f2   : > { %v1473_v16 = vadd.f32 %v1472_v11, %v1471_v10 }
 0x2f4   : > { %1474 = vst.msk [vmem:[#allocation2] sm:$0x3] %vm528_vm2, %v1473_v16  ;;  %2322 = vmatmul.mubr.msk.f32.vlgmr.msra.gmra.mrb[6].mxu0 %vm543_vm3, %v1473_v16  ;;  %2333 = vmatmul.mubr.msk.f32.vlgmr.msra.gmra.mrb[6].mxu1 %vm543_vm3, %v1473_v16 }
 0x2f5   : > { %2444 = vmatpush3.bf16.msra.mxu0 %v2443_v12  ;;  %2456 = vmatpush3.bf16.msra.mxu1 %v2455_v14 }
 0x2f6   : > { %2445 = vmatprep.subr.bf16.mxu0 %v2534_v5  ;;  %2457 = vmatprep.subr.bf16.mxu1 %v2534_v5 }
 0x2f7   : > { %2343 = vmatprep.mubr.msk.f32.mxu0 %vm2535_vm1, %v2536_v8  ;;  %2365 = vmatprep.mubr.msk.f32.mxu1 %vm2535_vm1, %v2536_v8 }
 0x2f9   : > { %2447 = vmatpush3.bf16.msra.mxu0 %v2446_v13  ;;  %2459 = vmatpush3.bf16.msra.mxu1 %v2458_v20 }
 0x2fa   : > { %2448 = vmatprep.subr.bf16.mxu0 %v2534_v5  ;;  %2460 = vmatprep.subr.bf16.mxu1 %v2534_v5 }
 0x2fc   : > { %2344 = vmatmul.mubr.msk.f32.vlgmr.msra.gmra.mrb[8].mxu0 %vm543_vm3, %v1473_v16  ;;  %2366 = vmatmul.mubr.msk.f32.vlgmr.msra.gmra.mrb[6].mxu1 %vm543_vm3, %v1726_v26 }
 0x2fd   : > { %2450 = vmatpush3.bf16.msra.mxu0 %v2449_v25  ;;  %2354 = vmatprep.mubr.msk.f32.mxu0 %vm2535_vm1, %v2536_v8 }
 0x2fe   : > { %2451 = vmatprep.subr.bf16.mxu0 %v2534_v5  ;;  %2462 = vmatpush3.bf16.msra.mxu1 %v2461_v29 }
 0x2ff   : > { %2463 = vmatprep.subr.bf16.mxu1 %v2534_v5  ;;  %2376 = vmatprep.mubr.msk.f32.mxu1 %vm2535_vm1, %v2536_v8  ;;  %v2121_v5 = vld [vmem:[%s2987_s15] ss:$0 sm:$0xff]  ;;  %v2112_v8 = vld [vmem:[%s2986_s14 + $0x1] ss:$0 sm:$0xff] }
 0x300   : > { %v2470_v40 = vadd.f32 %v2121_v5, %v2105_v38  ;;  %v2472_v41 = vadd.f32 %v2128_v39, %v2112_v8 }
 0x301   : > { %2453 = vmatpush3.bf16.msra.mxu0 %v2452_v32 }
 0x302   : > { %2465 = vmatpush3.bf16.msra.mxu1 %v2464_v33 }
 0x304   : > { %2355 = vmatmul.mubr.msk.f32.vlgmr.msra.gmra.mrb[6].mxu0 %vm543_vm3, %v1726_v26 }
 0x305   : > { %2377 = vmatmul.mubr.msk.f32.vlgmr.msra.gmra.mrb[8].mxu1 %vm543_vm3, %v1726_v26 }
 0x3cf   : > { %v1721_v34 = vpop.f32.mrb[8].mxu0  ;;  %v1890_v35 = vpop.f32.mrb[6].mxu1 }
 0x3d0   : > { %v2345_v36 = vpop.f32.mrb[9].mxu0  ;;  %v2367_v37 = vpop.f32.mrb[7].mxu1  ;;  %v2473_v48 = vadd.f32 %v2472_v41, %v1890_v35  ;;  %v1722_v58 = vadd.f32 %v2119_v56, %v1721_v34 }
 0x3d2   : > { %v2138_v49 = vmul.f32 -1.442695, %v2473_v48 }
 0x3d7   : > { %v1807_v42 = vpop.f32.mrb[6].mxu0 }
 0x3d8   : > { %v2471_v43 = vadd.f32 %v2470_v40, %v1807_v42  ;;  %v2356_v44 = vpop.f32.mrb[7].mxu0  ;;  %v1973_v45 = vpop.f32.mrb[8].mxu1 }
 0x3d9   : > { %v2378_v46 = vpop.f32.mrb[9].mxu1  ;;  %v1974_v55 = vadd.f32 %v2135_v53, %v1973_v45 }
 0x3da   : > { %v2137_v47 = vmul.f32 -1.442695, %v2471_v43 }
 0x3dc   : > { %2516 = vpow2.f32 %v2137_v47 }
 0x3dd   : > { %2518 = vpow2.f32 %v2138_v49 }
 0x3e6   : > { %v2517_v50 = vpop.eup %2516 }
 0x3e7   : > { %v1981_v51 = vadd.f32 1.0, %v2517_v50  ;;  %v2519_v52 = vpop.eup %2518 }
 0x3e8   : > { %v1988_v54 = vadd.f32 1.0, %v2519_v52 }
 0x3e9   : > { %2520 = vrcp.f32 %v1981_v51 }
 0x3ea   : > { %2522 = vrcp.f32 %v1988_v54 }
 0x3f3   : > { %v2521_v57 = vpop.eup %2520 }
 0x3f4   : > { %v1991_v59 = vmul.f32 %v2521_v57, %v1974_v55  ;;  %v2523_v61 = vpop.eup %2522 }
 0x3f5   : > { %v1994_v62 = vsub.f32 1.0, %v2523_v61  ;;  %v1996_v0 = vmul.f32 %v2523_v61, %v1726_v26 }
 0x3f6   : > { %v1992_v60 = vadd.f32 %v1991_v59, %v1722_v58 }
 0x3f8   : > { %2524 = vtanh.f32 %v1992_v60 }
 0x402   : > { %v2525_v63 = vpop.eup %2524 }
 0x403   : > { %v1995_v1 = vmul.f32 %v2525_v63, %v1994_v62 }
 0x405   : > { %v1997_v2 = vadd.f32 %v1996_v0, %v1995_v1 }
 0x407   : > { %1998 = vst.msk [vmem:[#allocation2 + $0x2] sm:$0x3] %vm528_vm2, %v1997_v2  ;;  %1999 = vst.msk [vmem:[%s2639_s0] sm:$0x3] %vm528_vm2, %v1997_v2 }
 0x408 PF: > { %s26_s21 = sadd.s32 1, %s2532_s21  }
 0x409   : > { %p23_p5 = scmp.ge.s32.totalorder %s26_s21, 6  }
 0x40b   :  { %25 = sbr.rel (!%p23_p5) target bundleno = 2 (0x2), region = 137 }

</bundles_post_ra>
